<compile_context>
chip_gen: v7x
topology: tpu7x:2x2x1
jax: 0.10.0
libtpu: 0.0.40
codegen_flags: <defaults>
</compile_context>

<pallas_src>
import jax
import jax.numpy as jnp
from jax.experimental import pallas as pl
from jax.experimental.pallas import tpu as pltpu

# ------------------------- model hyper-parameters ---------------------------
B = 2       # batch
LQ = 8      # query sequence length
LK = 8      # key / memory sequence length
D = 32      # model dim (layer.size)
NH = 4      # attention heads
DK = D // NH
DFF = 64    # feed-forward hidden dim
N_LAYERS = 2
EPS = 1e-6
SCALE = 1.0 / float(DK) ** 0.5


def _layernorm(v, g, b, feat):
    # Annotated-Transformer LayerNorm: unbiased std (ddof=1), eps added to std.
    mean = jnp.mean(v, axis=-1, keepdims=True)
    var = jnp.sum((v - mean) ** 2, axis=-1, keepdims=True) / (feat - 1)
    std = jnp.sqrt(var)
    return g * (v - mean) / (std + EPS) + b


# ------------------------------ fused kernel ---------------------------------
def decoder_kernel(x_ref, mem_ref, bias_ref, wkv_ref, wqo1_ref, w2_ref,
                   vec32_ref, vec64_ref, fnorm_ref, out_ref):
    """Whole decoder (N layers + final LayerNorm) in a single program."""
    x = x_ref[...].astype(jnp.float32)        # [B*LQ, D]
    mem = mem_ref[...].astype(jnp.float32)    # [B*LK, D]
    bias = bias_ref[...]                      # [NH*B, LQ, LK] additive mask bias
    scale = jnp.float32(SCALE)

    # Layer-invariant KV projection, hoisted: one lane-dense (16, 128) matmul.
    kv_all = jnp.dot(mem, wkv_ref[...], preferred_element_type=jnp.float32)

    for l in range(N_LAYERS):                 # static, unrolled (N_LAYERS small)
        wqo1 = wqo1_ref[l]                    # [D, D + D + DFF] = [32, 128]
        wq = wqo1[:, :D]
        wo = wqo1[:, D:2 * D]
        w1 = wqo1[:, 2 * D:]
        w2 = w2_ref[l]                        # [DFF, D]
        v32 = vec32_ref[l]                    # [7, D]
        ln1_g, ln1_b, bq, bo, ln2_g, ln2_b, b2 = (v32[i] for i in range(7))
        v64 = vec64_ref[l]                    # [2, 64]
        bkv, b1 = v64[0], v64[1]

        # ---- sublayer 0: cross multi-head attention (pre-norm + residual) ----
        xn = _layernorm(x, ln1_g, ln1_b, D)
        q = jnp.dot(xn, wq, preferred_element_type=jnp.float32) + bq      # [16, 32]
        kv = kv_all[:, l * 2 * D:(l + 1) * 2 * D] + bkv                   # [16, 64]
        k = kv[:, :D]
        v = kv[:, D:]

        # Fold heads into the batch dim once: (NH*B, L, DK), ordering h*B + b.
        qs = jnp.concatenate(
            [q[:, h * DK:(h + 1) * DK].reshape(B, LQ, DK) for h in range(NH)], axis=0)
        ks = jnp.concatenate(
            [k[:, h * DK:(h + 1) * DK].reshape(B, LK, DK) for h in range(NH)], axis=0)
        vs = jnp.concatenate(
            [v[:, h * DK:(h + 1) * DK].reshape(B, LK, DK) for h in range(NH)], axis=0)

        # One score einsum, one fused softmax, one context einsum per layer.
        s = jnp.einsum("bqd,bkd->bqk", qs, ks,
                       preferred_element_type=jnp.float32) * scale + bias
        s = s - jnp.max(s, axis=-1, keepdims=True)
        p = jnp.exp(s)
        p = p * pl.reciprocal(jnp.sum(p, axis=-1, keepdims=True), approx=True)
        ctx = jnp.einsum("bqk,bkd->bqd", p, vs,
                         preferred_element_type=jnp.float32)              # [NH*B, LQ, DK]

        # Concat heads back along lanes -> single K=32 output-projection matmul.
        ctx_cat = jnp.concatenate(
            [ctx[h * B:(h + 1) * B].reshape(B * LQ, DK) for h in range(NH)], axis=-1)
        x = x + jnp.dot(ctx_cat, wo, preferred_element_type=jnp.float32) + bo

        # ---- sublayer 1: position-wise feed forward (pre-norm + residual) ----
        xn2 = _layernorm(x, ln2_g, ln2_b, D)
        h1 = jnp.dot(xn2, w1, preferred_element_type=jnp.float32) + b1
        h1 = jnp.maximum(h1, 0.0)
        x = x + jnp.dot(h1, w2, preferred_element_type=jnp.float32) + b2

    # ---- final LayerNorm ----
    out_ref[...] = _layernorm(x, fnorm_ref[0], fnorm_ref[1], D).astype(out_ref.dtype)


# ------------------------------ wrapper --------------------------------------
@jax.jit
def decoder_forward(query, key, src_mask, params):
    x2d = query.reshape(B * LQ, D)
    mem2d = key.reshape(B * LK, D)
    # Additive mask bias, built once outside the kernel, pre-broadcast over heads
    # to the fused (NH*B, LQ, LK) layout (index = h*B + b).
    bias = jnp.where(src_mask > 0, 0.0, -1e9).astype(jnp.float32)
    bias = jnp.tile(bias, (NH, 1, 1))

    # --- pack parameters into a handful of lane-dense slabs (fewer DMAs) ---
    # all layers' KV weights along the output dim: (D, N_LAYERS*2D) = (32, 128)
    wkv_all = params["wkv"].transpose(1, 0, 2).reshape(D, N_LAYERS * 2 * D)
    # wq | wo | w1 per layer: (N_LAYERS, D, D + D + DFF) = (2, 32, 128)
    w_qo1 = jnp.concatenate([params["wq"], params["wo"], params["w1"]], axis=-1)
    w2 = params["w2"]                                                   # (N_LAYERS, DFF, D)
    vec32 = jnp.stack([params["ln1_g"], params["ln1_b"], params["bq"], params["bo"],
                       params["ln2_g"], params["ln2_b"], params["b2"]], axis=1)  # (N, 7, D)
    vec64 = jnp.stack([params["bkv"], params["b1"]], axis=1)            # (N, 2, 64)
    fnorm = jnp.concatenate([params["norm_g"], params["norm_b"]], axis=0)  # (2, D)

    inputs = [x2d, mem2d, bias, wkv_all, w_qo1, w2, vec32, vec64, fnorm]

    vmem = pltpu.MemorySpace.VMEM
    out = pl.pallas_call(
        decoder_kernel,
        out_shape=jax.ShapeDtypeStruct((B * LQ, D), jnp.float32),
        in_specs=[pl.BlockSpec(memory_space=vmem) for _ in inputs],
        out_specs=pl.BlockSpec(memory_space=vmem),
    )(*inputs)
    return out.reshape(B, LQ, D)


# --------------------------- pure-JAX reference --------------------------------
def _ref_forward(query, key, mask, params):
    x = query.astype(jnp.float32)
    mem = key.astype(jnp.float32)
    for l in range(N_LAYERS):
        xn = _layernorm(x, params["ln1_g"][l], params["ln1_b"][l], D)
        q = xn @ params["wq"][l] + params["bq"][l]
        kv = mem @ params["wkv"][l] + params["bkv"][l]
        k, v = kv[..., :D], kv[..., D:]
        qh = q.reshape(B, LQ, NH, DK).transpose(0, 2, 1, 3)
        kh = k.reshape(B, LK, NH, DK).transpose(0, 2, 1, 3)
        vh = v.reshape(B, LK, NH, DK).transpose(0, 2, 1, 3)
        s = jnp.einsum("bhqd,bhkd->bhqk", qh, kh) * SCALE
        s = jnp.where(mask[:, None, :, :] > 0, s, -1e9)
        p = jax.nn.softmax(s, axis=-1)
        ctx = jnp.einsum("bhqk,bhkd->bhqd", p, vh).transpose(0, 2, 1, 3).reshape(B, LQ, D)
        x = x + ctx @ params["wo"][l] + params["bo"][l]
        xn2 = _layernorm(x, params["ln2_g"][l], params["ln2_b"][l], D)
        ff = jnp.maximum(xn2 @ params["w1"][l] + params["b1"][l], 0.0) @ params["w2"][l] \
             + params["b2"][l]
        x = x + ff
    return _layernorm(x, params["norm_g"][0], params["norm_b"][0], D)


# ------------------------------- init & main ----------------------------------
def _init_params(key):
    def dense(k, fan_in, fan_out):
        return 0.05 * jax.random.normal(k, (fan_in, fan_out), jnp.float32)

    def vec(k, n, scale=0.05):
        return scale * jax.random.normal(k, (N_LAYERS, n), jnp.float32)

    wq, wk, wv, wo, w1, w2 = [], [], [], [], [], []
    for i in range(N_LAYERS):
        ks = jax.random.split(jax.random.fold_in(key, i), 6)
        wq.append(dense(ks[0], D, D))
        wk.append(dense(ks[1], D, D))
        wv.append(dense(ks[2], D, D))
        wo.append(dense(ks[3], D, D))
        w1.append(dense(ks[4], D, DFF))
        w2.append(dense(ks[5], DFF, D))

    bk = jax.random.split(jax.random.fold_in(key, 1000), 12)
    params = {
        "ln1_g": 1.0 + 0.1 * jax.random.normal(bk[0], (N_LAYERS, D), jnp.float32),
        "ln1_b": 0.1 * jax.random.normal(bk[1], (N_LAYERS, D), jnp.float32),
        "wq": jnp.stack(wq), "bq": vec(bk[2], D),
        # fused K/V projection: wkv = [wk | wv] along the output dim
        "wkv": jnp.concatenate([jnp.stack(wk), jnp.stack(wv)], axis=-1),
        "bkv": vec(bk[3], 2 * D),
        "wo": jnp.stack(wo), "bo": vec(bk[4], D),
        "ln2_g": 1.0 + 0.1 * jax.random.normal(bk[5], (N_LAYERS, D), jnp.float32),
        "ln2_b": 0.1 * jax.random.normal(bk[6], (N_LAYERS, D), jnp.float32),
        "w1": jnp.stack(w1), "b1": vec(bk[7], DFF),
        "w2": jnp.stack(w2), "b2": vec(bk[8], D),
        "norm_g": 1.0 + 0.1 * jax.random.normal(bk[9], (1, D), jnp.float32),
        "norm_b": 0.1 * jax.random.normal(bk[10], (1, D), jnp.float32),
    }
    return params


if __name__ == "__main__":
    root = jax.random.PRNGKey(0)
    kq, kk, kp = jax.random.split(root, 3)
    query = jax.random.normal(kq, (B, LQ, D), jnp.float32)
    key = jax.random.normal(kk, (B, LK, D), jnp.float32)
    # src_mask: mask out the last two key positions of batch element 1.
    src_mask = jnp.ones((B, LQ, LK), jnp.float32)
    src_mask = src_mask.at[1, :, LK - 2:].set(0.0)
    params = _init_params(kp)

    out = decoder_forward(query, key, src_mask, params)
    out = jax.block_until_ready(out)

    ref = _ref_forward(query, key, src_mask, params)
    assert out.shape == (B, LQ, D)
    assert jnp.allclose(out, ref, atol=1e-2, rtol=1e-2), float(jnp.max(jnp.abs(out - ref)))
    print("KERNEL_OK")
</pallas_src>

<mosaic_0001>
module attributes {stable_mosaic.version = 11 : i64} {
  func.func @decoder_kernel(%arg0: memref<16x32xf32, #tpu.memory_space<vmem>>, %arg1: memref<16x32xf32, #tpu.memory_space<vmem>>, %arg2: memref<8x8x8xf32, #tpu.memory_space<vmem>>, %arg3: memref<32x128xf32, #tpu.memory_space<vmem>>, %arg4: memref<2x32x128xf32, #tpu.memory_space<vmem>>, %arg5: memref<2x64x32xf32, #tpu.memory_space<vmem>>, %arg6: memref<2x7x32xf32, #tpu.memory_space<vmem>>, %arg7: memref<2x2x64xf32, #tpu.memory_space<vmem>>, %arg8: memref<2x32xf32, #tpu.memory_space<vmem>>, %arg9: memref<16x32xf32, #tpu.memory_space<vmem>>) attributes {dimension_semantics = [], scalar_prefetch = 0 : i64, scratch_operands = 0 : i64, tpu.core_type = #tpu.core_type<tc>} {
    %c0 = arith.constant 0 : index
    %c0_0 = arith.constant 0 : index
    %0 = vector.load %arg0[%c0, %c0_0] : memref<16x32xf32, #tpu.memory_space<vmem>>, vector<16x32xf32>
    %c0_1 = arith.constant 0 : index
    %c0_2 = arith.constant 0 : index
    %1 = vector.load %arg1[%c0_1, %c0_2] : memref<16x32xf32, #tpu.memory_space<vmem>>, vector<16x32xf32>
    %c0_3 = arith.constant 0 : index
    %c0_4 = arith.constant 0 : index
    %c0_5 = arith.constant 0 : index
    %2 = vector.load %arg2[%c0_3, %c0_4, %c0_5] : memref<8x8x8xf32, #tpu.memory_space<vmem>>, vector<8x8x8xf32>
    %c0_6 = arith.constant 0 : index
    %c0_7 = arith.constant 0 : index
    %3 = vector.load %arg3[%c0_6, %c0_7] : memref<32x128xf32, #tpu.memory_space<vmem>>, vector<32x128xf32>
    %cst = arith.constant dense<0.000000e+00> : vector<16x128xf32>
    %4 = tpu.matmul %1, %3, %cst {dimension_numbers = #tpu.dot_dimension_numbers<[1], [0], [0], [1], [0, 0, 1, 1], [], []>} : vector<16x32xf32>, vector<32x128xf32>, vector<16x128xf32> -> vector<16x128xf32>
    %c0_8 = arith.constant 0 : index
    %c0_9 = arith.constant 0 : index
    %c0_10 = arith.constant 0 : index
    %5 = vector.load %arg4[%c0_8, %c0_9, %c0_10] : memref<2x32x128xf32, #tpu.memory_space<vmem>>, vector<1x32x128xf32>
    %6 = vector.shape_cast %5 : vector<1x32x128xf32> to vector<32x128xf32>
    %7 = vector.extract_strided_slice %6 {offsets = [0, 0], sizes = [32, 32], strides = [1, 1]} : vector<32x128xf32> to vector<32x32xf32>
    %8 = vector.extract_strided_slice %6 {offsets = [0, 32], sizes = [32, 32], strides = [1, 1]} : vector<32x128xf32> to vector<32x32xf32>
    %9 = vector.extract_strided_slice %6 {offsets = [0, 64], sizes = [32, 64], strides = [1, 1]} : vector<32x128xf32> to vector<32x64xf32>
    %c0_11 = arith.constant 0 : index
    %c0_12 = arith.constant 0 : index
    %c0_13 = arith.constant 0 : index
    %10 = vector.load %arg5[%c0_11, %c0_12, %c0_13] : memref<2x64x32xf32, #tpu.memory_space<vmem>>, vector<1x64x32xf32>
    %11 = vector.shape_cast %10 : vector<1x64x32xf32> to vector<64x32xf32>
    %c0_14 = arith.constant 0 : index
    %c0_15 = arith.constant 0 : index
    %c0_16 = arith.constant 0 : index
    %12 = vector.load %arg6[%c0_14, %c0_15, %c0_16] : memref<2x7x32xf32, #tpu.memory_space<vmem>>, vector<1x7x32xf32>
    %13 = vector.shape_cast %12 : vector<1x7x32xf32> to vector<7x32xf32>
    %14 = vector.extract_strided_slice %13 {offsets = [0, 0], sizes = [1, 32], strides = [1, 1]} : vector<7x32xf32> to vector<1x32xf32>
    %15 = vector.shape_cast %14 : vector<1x32xf32> to vector<32xf32>
    %16 = vector.extract_strided_slice %13 {offsets = [1, 0], sizes = [1, 32], strides = [1, 1]} : vector<7x32xf32> to vector<1x32xf32>
    %17 = vector.shape_cast %16 : vector<1x32xf32> to vector<32xf32>
    %18 = vector.extract_strided_slice %13 {offsets = [2, 0], sizes = [1, 32], strides = [1, 1]} : vector<7x32xf32> to vector<1x32xf32>
    %19 = vector.shape_cast %18 : vector<1x32xf32> to vector<32xf32>
    %20 = vector.extract_strided_slice %13 {offsets = [3, 0], sizes = [1, 32], strides = [1, 1]} : vector<7x32xf32> to vector<1x32xf32>
    %21 = vector.shape_cast %20 : vector<1x32xf32> to vector<32xf32>
    %22 = vector.extract_strided_slice %13 {offsets = [4, 0], sizes = [1, 32], strides = [1, 1]} : vector<7x32xf32> to vector<1x32xf32>
    %23 = vector.shape_cast %22 : vector<1x32xf32> to vector<32xf32>
    %24 = vector.extract_strided_slice %13 {offsets = [5, 0], sizes = [1, 32], strides = [1, 1]} : vector<7x32xf32> to vector<1x32xf32>
    %25 = vector.shape_cast %24 : vector<1x32xf32> to vector<32xf32>
    %26 = vector.extract_strided_slice %13 {offsets = [6, 0], sizes = [1, 32], strides = [1, 1]} : vector<7x32xf32> to vector<1x32xf32>
    %27 = vector.shape_cast %26 : vector<1x32xf32> to vector<32xf32>
    %c0_17 = arith.constant 0 : index
    %c0_18 = arith.constant 0 : index
    %c0_19 = arith.constant 0 : index
    %28 = vector.load %arg7[%c0_17, %c0_18, %c0_19] : memref<2x2x64xf32, #tpu.memory_space<vmem>>, vector<1x2x64xf32>
    %29 = vector.shape_cast %28 : vector<1x2x64xf32> to vector<2x64xf32>
    %30 = vector.extract_strided_slice %29 {offsets = [0, 0], sizes = [1, 64], strides = [1, 1]} : vector<2x64xf32> to vector<1x64xf32>
    %31 = vector.shape_cast %30 : vector<1x64xf32> to vector<64xf32>
    %32 = vector.extract_strided_slice %29 {offsets = [1, 0], sizes = [1, 64], strides = [1, 1]} : vector<2x64xf32> to vector<1x64xf32>
    %33 = vector.shape_cast %32 : vector<1x64xf32> to vector<64xf32>
    %cst_20 = arith.constant dense<0.000000e+00> : vector<16xf32>
    %34 = vector.multi_reduction <add>, %0, %cst_20 [1] : vector<16x32xf32> to vector<16xf32>
    %35 = vector.shape_cast %34 : vector<16xf32> to vector<16x1xf32>
    %cst_21 = arith.constant 3.200000e+01 : f32
    %36 = vector.broadcast %cst_21 : f32 to vector<16x1xf32>
    %37 = arith.divf %35, %36 : vector<16x1xf32>
    %38 = vector.broadcast %37 : vector<16x1xf32> to vector<16x32xf32>
    %39 = arith.subf %0, %38 : vector<16x32xf32>
    %40 = arith.mulf %39, %39 : vector<16x32xf32>
    %cst_22 = arith.constant dense<0.000000e+00> : vector<16xf32>
    %41 = vector.multi_reduction <add>, %40, %cst_22 [1] : vector<16x32xf32> to vector<16xf32>
    %42 = vector.shape_cast %41 : vector<16xf32> to vector<16x1xf32>
    %cst_23 = arith.constant 3.100000e+01 : f32
    %43 = vector.broadcast %cst_23 : f32 to vector<16x1xf32>
    %44 = arith.divf %42, %43 : vector<16x1xf32>
    %45 = math.sqrt %44 : vector<16x1xf32>
    %46 = vector.broadcast %37 : vector<16x1xf32> to vector<16x32xf32>
    %47 = arith.subf %0, %46 : vector<16x32xf32>
    %48 = vector.shape_cast %15 : vector<32xf32> to vector<1x32xf32>
    %49 = vector.broadcast %48 : vector<1x32xf32> to vector<16x32xf32>
    %50 = arith.mulf %49, %47 : vector<16x32xf32>
    %cst_24 = arith.constant 9.99999997E-7 : f32
    %51 = vector.broadcast %cst_24 : f32 to vector<16x1xf32>
    %52 = arith.addf %45, %51 : vector<16x1xf32>
    %53 = vector.broadcast %52 : vector<16x1xf32> to vector<16x32xf32>
    %54 = arith.divf %50, %53 : vector<16x32xf32>
    %55 = vector.shape_cast %17 : vector<32xf32> to vector<1x32xf32>
    %56 = vector.broadcast %55 : vector<1x32xf32> to vector<16x32xf32>
    %57 = arith.addf %54, %56 : vector<16x32xf32>
    %cst_25 = arith.constant dense<0.000000e+00> : vector<16x32xf32>
    %58 = tpu.matmul %57, %7, %cst_25 {dimension_numbers = #tpu.dot_dimension_numbers<[1], [0], [0], [1], [0, 0, 1, 1], [], []>} : vector<16x32xf32>, vector<32x32xf32>, vector<16x32xf32> -> vector<16x32xf32>
    %59 = vector.shape_cast %19 : vector<32xf32> to vector<1x32xf32>
    %60 = vector.broadcast %59 : vector<1x32xf32> to vector<16x32xf32>
    %61 = arith.addf %58, %60 : vector<16x32xf32>
    %62 = vector.extract_strided_slice %4 {offsets = [0, 0], sizes = [16, 64], strides = [1, 1]} : vector<16x128xf32> to vector<16x64xf32>
    %63 = vector.shape_cast %31 : vector<64xf32> to vector<1x64xf32>
    %64 = vector.broadcast %63 : vector<1x64xf32> to vector<16x64xf32>
    %65 = arith.addf %62, %64 : vector<16x64xf32>
    %66 = vector.extract_strided_slice %65 {offsets = [0, 0], sizes = [16, 32], strides = [1, 1]} : vector<16x64xf32> to vector<16x32xf32>
    %67 = vector.extract_strided_slice %65 {offsets = [0, 32], sizes = [16, 32], strides = [1, 1]} : vector<16x64xf32> to vector<16x32xf32>
    %68 = vector.extract_strided_slice %61 {offsets = [0, 0], sizes = [16, 8], strides = [1, 1]} : vector<16x32xf32> to vector<16x8xf32>
    %69 = vector.shape_cast %68 : vector<16x8xf32> to vector<2x8x8xf32>
    %70 = vector.extract_strided_slice %61 {offsets = [0, 8], sizes = [16, 8], strides = [1, 1]} : vector<16x32xf32> to vector<16x8xf32>
    %71 = vector.shape_cast %70 : vector<16x8xf32> to vector<2x8x8xf32>
    %72 = vector.extract_strided_slice %61 {offsets = [0, 16], sizes = [16, 8], strides = [1, 1]} : vector<16x32xf32> to vector<16x8xf32>
    %73 = vector.shape_cast %72 : vector<16x8xf32> to vector<2x8x8xf32>
    %74 = vector.extract_strided_slice %61 {offsets = [0, 24], sizes = [16, 8], strides = [1, 1]} : vector<16x32xf32> to vector<16x8xf32>
    %75 = vector.shape_cast %74 : vector<16x8xf32> to vector<2x8x8xf32>
    %76 = tpu.concatenate %69, %71, %73, %75 in 0 : vector<2x8x8xf32>, vector<2x8x8xf32>, vector<2x8x8xf32>, vector<2x8x8xf32> -> vector<8x8x8xf32>
    %77 = vector.extract_strided_slice %66 {offsets = [0, 0], sizes = [16, 8], strides = [1, 1]} : vector<16x32xf32> to vector<16x8xf32>
    %78 = vector.shape_cast %77 : vector<16x8xf32> to vector<2x8x8xf32>
    %79 = vector.extract_strided_slice %66 {offsets = [0, 8], sizes = [16, 8], strides = [1, 1]} : vector<16x32xf32> to vector<16x8xf32>
    %80 = vector.shape_cast %79 : vector<16x8xf32> to vector<2x8x8xf32>
    %81 = vector.extract_strided_slice %66 {offsets = [0, 16], sizes = [16, 8], strides = [1, 1]} : vector<16x32xf32> to vector<16x8xf32>
    %82 = vector.shape_cast %81 : vector<16x8xf32> to vector<2x8x8xf32>
    %83 = vector.extract_strided_slice %66 {offsets = [0, 24], sizes = [16, 8], strides = [1, 1]} : vector<16x32xf32> to vector<16x8xf32>
    %84 = vector.shape_cast %83 : vector<16x8xf32> to vector<2x8x8xf32>
    %85 = tpu.concatenate %78, %80, %82, %84 in 0 : vector<2x8x8xf32>, vector<2x8x8xf32>, vector<2x8x8xf32>, vector<2x8x8xf32> -> vector<8x8x8xf32>
    %86 = vector.extract_strided_slice %67 {offsets = [0, 0], sizes = [16, 8], strides = [1, 1]} : vector<16x32xf32> to vector<16x8xf32>
    %87 = vector.shape_cast %86 : vector<16x8xf32> to vector<2x8x8xf32>
    %88 = vector.extract_strided_slice %67 {offsets = [0, 8], sizes = [16, 8], strides = [1, 1]} : vector<16x32xf32> to vector<16x8xf32>
    %89 = vector.shape_cast %88 : vector<16x8xf32> to vector<2x8x8xf32>
    %90 = vector.extract_strided_slice %67 {offsets = [0, 16], sizes = [16, 8], strides = [1, 1]} : vector<16x32xf32> to vector<16x8xf32>
    %91 = vector.shape_cast %90 : vector<16x8xf32> to vector<2x8x8xf32>
    %92 = vector.extract_strided_slice %67 {offsets = [0, 24], sizes = [16, 8], strides = [1, 1]} : vector<16x32xf32> to vector<16x8xf32>
    %93 = vector.shape_cast %92 : vector<16x8xf32> to vector<2x8x8xf32>
    %94 = tpu.concatenate %87, %89, %91, %93 in 0 : vector<2x8x8xf32>, vector<2x8x8xf32>, vector<2x8x8xf32>, vector<2x8x8xf32> -> vector<8x8x8xf32>
    "tpu.trace_start"() <{level = 10 : i32, message = "bqd,bkd->bqk"}> : () -> ()
    %cst_26 = arith.constant dense<0.000000e+00> : vector<8x8x8xf32>
    %95 = tpu.matmul %76, %85, %cst_26 {dimension_numbers = #tpu.dot_dimension_numbers<[2], [2], [1], [1], [0, 0, 0, 1, 1, 1], [0], [0]>} : vector<8x8x8xf32>, vector<8x8x8xf32>, vector<8x8x8xf32> -> vector<8x8x8xf32>
    "tpu.trace_stop"() : () -> ()
    %cst_27 = arith.constant 0.353553385 : f32
    %96 = vector.broadcast %cst_27 : f32 to vector<8x8x8xf32>
    %97 = arith.mulf %95, %96 : vector<8x8x8xf32>
    %98 = arith.addf %97, %2 : vector<8x8x8xf32>
    %cst_28 = arith.constant dense<0xFF800000> : vector<8x8xf32>
    %99 = vector.multi_reduction <maximumf>, %98, %cst_28 [2] : vector<8x8x8xf32> to vector<8x8xf32>
    %100 = vector.shape_cast %99 : vector<8x8xf32> to vector<8x8x1xf32>
    %101 = vector.broadcast %100 : vector<8x8x1xf32> to vector<8x8x8xf32>
    %102 = arith.subf %98, %101 : vector<8x8x8xf32>
    %103 = math.exp %102 : vector<8x8x8xf32>
    %cst_29 = arith.constant dense<0.000000e+00> : vector<8x8xf32>
    %104 = vector.multi_reduction <add>, %103, %cst_29 [2] : vector<8x8x8xf32> to vector<8x8xf32>
    %105 = vector.shape_cast %104 : vector<8x8xf32> to vector<8x8x1xf32>
    %106 = tpu.reciprocal %105 {approx = true} : vector<8x8x1xf32> -> vector<8x8x1xf32>
    %107 = vector.broadcast %106 : vector<8x8x1xf32> to vector<8x8x8xf32>
    %108 = arith.mulf %103, %107 : vector<8x8x8xf32>
    "tpu.trace_start"() <{level = 10 : i32, message = "bqk,bkd->bqd"}> : () -> ()
    %cst_30 = arith.constant dense<0.000000e+00> : vector<8x8x8xf32>
    %109 = tpu.matmul %108, %94, %cst_30 {dimension_numbers = #tpu.dot_dimension_numbers<[2], [1], [1], [2], [0, 0, 0, 1, 1, 2], [0], [0]>} : vector<8x8x8xf32>, vector<8x8x8xf32>, vector<8x8x8xf32> -> vector<8x8x8xf32>
    "tpu.trace_stop"() : () -> ()
    %110 = vector.extract_strided_slice %109 {offsets = [0, 0, 0], sizes = [2, 8, 8], strides = [1, 1, 1]} : vector<8x8x8xf32> to vector<2x8x8xf32>
    %111 = vector.shape_cast %110 : vector<2x8x8xf32> to vector<16x8xf32>
    %112 = vector.extract_strided_slice %109 {offsets = [2, 0, 0], sizes = [2, 8, 8], strides = [1, 1, 1]} : vector<8x8x8xf32> to vector<2x8x8xf32>
    %113 = vector.shape_cast %112 : vector<2x8x8xf32> to vector<16x8xf32>
    %114 = vector.extract_strided_slice %109 {offsets = [4, 0, 0], sizes = [2, 8, 8], strides = [1, 1, 1]} : vector<8x8x8xf32> to vector<2x8x8xf32>
    %115 = vector.shape_cast %114 : vector<2x8x8xf32> to vector<16x8xf32>
    %116 = vector.extract_strided_slice %109 {offsets = [6, 0, 0], sizes = [2, 8, 8], strides = [1, 1, 1]} : vector<8x8x8xf32> to vector<2x8x8xf32>
    %117 = vector.shape_cast %116 : vector<2x8x8xf32> to vector<16x8xf32>
    %118 = tpu.concatenate %111, %113, %115, %117 in 1 : vector<16x8xf32>, vector<16x8xf32>, vector<16x8xf32>, vector<16x8xf32> -> vector<16x32xf32>
    %cst_31 = arith.constant dense<0.000000e+00> : vector<16x32xf32>
    %119 = tpu.matmul %118, %8, %cst_31 {dimension_numbers = #tpu.dot_dimension_numbers<[1], [0], [0], [1], [0, 0, 1, 1], [], []>} : vector<16x32xf32>, vector<32x32xf32>, vector<16x32xf32> -> vector<16x32xf32>
    %120 = arith.addf %0, %119 : vector<16x32xf32>
    %121 = vector.shape_cast %21 : vector<32xf32> to vector<1x32xf32>
    %122 = vector.broadcast %121 : vector<1x32xf32> to vector<16x32xf32>
    %123 = arith.addf %120, %122 : vector<16x32xf32>
    %cst_32 = arith.constant dense<0.000000e+00> : vector<16xf32>
    %124 = vector.multi_reduction <add>, %123, %cst_32 [1] : vector<16x32xf32> to vector<16xf32>
    %125 = vector.shape_cast %124 : vector<16xf32> to vector<16x1xf32>
    %cst_33 = arith.constant 3.200000e+01 : f32
    %126 = vector.broadcast %cst_33 : f32 to vector<16x1xf32>
    %127 = arith.divf %125, %126 : vector<16x1xf32>
    %128 = vector.broadcast %127 : vector<16x1xf32> to vector<16x32xf32>
    %129 = arith.subf %123, %128 : vector<16x32xf32>
    %130 = arith.mulf %129, %129 : vector<16x32xf32>
    %cst_34 = arith.constant dense<0.000000e+00> : vector<16xf32>
    %131 = vector.multi_reduction <add>, %130, %cst_34 [1] : vector<16x32xf32> to vector<16xf32>
    %132 = vector.shape_cast %131 : vector<16xf32> to vector<16x1xf32>
    %cst_35 = arith.constant 3.100000e+01 : f32
    %133 = vector.broadcast %cst_35 : f32 to vector<16x1xf32>
    %134 = arith.divf %132, %133 : vector<16x1xf32>
    %135 = math.sqrt %134 : vector<16x1xf32>
    %136 = vector.broadcast %127 : vector<16x1xf32> to vector<16x32xf32>
    %137 = arith.subf %123, %136 : vector<16x32xf32>
    %138 = vector.shape_cast %23 : vector<32xf32> to vector<1x32xf32>
    %139 = vector.broadcast %138 : vector<1x32xf32> to vector<16x32xf32>
    %140 = arith.mulf %139, %137 : vector<16x32xf32>
    %cst_36 = arith.constant 9.99999997E-7 : f32
    %141 = vector.broadcast %cst_36 : f32 to vector<16x1xf32>
    %142 = arith.addf %135, %141 : vector<16x1xf32>
    %143 = vector.broadcast %142 : vector<16x1xf32> to vector<16x32xf32>
    %144 = arith.divf %140, %143 : vector<16x32xf32>
    %145 = vector.shape_cast %25 : vector<32xf32> to vector<1x32xf32>
    %146 = vector.broadcast %145 : vector<1x32xf32> to vector<16x32xf32>
    %147 = arith.addf %144, %146 : vector<16x32xf32>
    %cst_37 = arith.constant dense<0.000000e+00> : vector<16x64xf32>
    %148 = tpu.matmul %147, %9, %cst_37 {dimension_numbers = #tpu.dot_dimension_numbers<[1], [0], [0], [1], [0, 0, 1, 1], [], []>} : vector<16x32xf32>, vector<32x64xf32>, vector<16x64xf32> -> vector<16x64xf32>
    %149 = vector.shape_cast %33 : vector<64xf32> to vector<1x64xf32>
    %150 = vector.broadcast %149 : vector<1x64xf32> to vector<16x64xf32>
    %151 = arith.addf %148, %150 : vector<16x64xf32>
    %cst_38 = arith.constant 0.000000e+00 : f32
    %152 = vector.broadcast %cst_38 : f32 to vector<16x64xf32>
    %153 = arith.maximumf %151, %152 : vector<16x64xf32>
    %cst_39 = arith.constant dense<0.000000e+00> : vector<16x32xf32>
    %154 = tpu.matmul %153, %11, %cst_39 {dimension_numbers = #tpu.dot_dimension_numbers<[1], [0], [0], [1], [0, 0, 1, 1], [], []>} : vector<16x64xf32>, vector<64x32xf32>, vector<16x32xf32> -> vector<16x32xf32>
    %155 = arith.addf %123, %154 : vector<16x32xf32>
    %156 = vector.shape_cast %27 : vector<32xf32> to vector<1x32xf32>
    %157 = vector.broadcast %156 : vector<1x32xf32> to vector<16x32xf32>
    %158 = arith.addf %155, %157 : vector<16x32xf32>
    %c1 = arith.constant 1 : index
    %c0_40 = arith.constant 0 : index
    %c0_41 = arith.constant 0 : index
    %159 = vector.load %arg4[%c1, %c0_40, %c0_41] : memref<2x32x128xf32, #tpu.memory_space<vmem>>, vector<1x32x128xf32>
    %160 = vector.shape_cast %159 : vector<1x32x128xf32> to vector<32x128xf32>
    %161 = vector.extract_strided_slice %160 {offsets = [0, 0], sizes = [32, 32], strides = [1, 1]} : vector<32x128xf32> to vector<32x32xf32>
    %162 = vector.extract_strided_slice %160 {offsets = [0, 32], sizes = [32, 32], strides = [1, 1]} : vector<32x128xf32> to vector<32x32xf32>
    %163 = vector.extract_strided_slice %160 {offsets = [0, 64], sizes = [32, 64], strides = [1, 1]} : vector<32x128xf32> to vector<32x64xf32>
    %c1_42 = arith.constant 1 : index
    %c0_43 = arith.constant 0 : index
    %c0_44 = arith.constant 0 : index
    %164 = vector.load %arg5[%c1_42, %c0_43, %c0_44] : memref<2x64x32xf32, #tpu.memory_space<vmem>>, vector<1x64x32xf32>
    %165 = vector.shape_cast %164 : vector<1x64x32xf32> to vector<64x32xf32>
    %c1_45 = arith.constant 1 : index
    %c0_46 = arith.constant 0 : index
    %c0_47 = arith.constant 0 : index
    %166 = vector.load %arg6[%c1_45, %c0_46, %c0_47] : memref<2x7x32xf32, #tpu.memory_space<vmem>>, vector<1x7x32xf32>
    %167 = vector.shape_cast %166 : vector<1x7x32xf32> to vector<7x32xf32>
    %168 = vector.extract_strided_slice %167 {offsets = [0, 0], sizes = [1, 32], strides = [1, 1]} : vector<7x32xf32> to vector<1x32xf32>
    %169 = vector.shape_cast %168 : vector<1x32xf32> to vector<32xf32>
    %170 = vector.extract_strided_slice %167 {offsets = [1, 0], sizes = [1, 32], strides = [1, 1]} : vector<7x32xf32> to vector<1x32xf32>
    %171 = vector.shape_cast %170 : vector<1x32xf32> to vector<32xf32>
    %172 = vector.extract_strided_slice %167 {offsets = [2, 0], sizes = [1, 32], strides = [1, 1]} : vector<7x32xf32> to vector<1x32xf32>
    %173 = vector.shape_cast %172 : vector<1x32xf32> to vector<32xf32>
    %174 = vector.extract_strided_slice %167 {offsets = [3, 0], sizes = [1, 32], strides = [1, 1]} : vector<7x32xf32> to vector<1x32xf32>
    %175 = vector.shape_cast %174 : vector<1x32xf32> to vector<32xf32>
    %176 = vector.extract_strided_slice %167 {offsets = [4, 0], sizes = [1, 32], strides = [1, 1]} : vector<7x32xf32> to vector<1x32xf32>
    %177 = vector.shape_cast %176 : vector<1x32xf32> to vector<32xf32>
    %178 = vector.extract_strided_slice %167 {offsets = [5, 0], sizes = [1, 32], strides = [1, 1]} : vector<7x32xf32> to vector<1x32xf32>
    %179 = vector.shape_cast %178 : vector<1x32xf32> to vector<32xf32>
    %180 = vector.extract_strided_slice %167 {offsets = [6, 0], sizes = [1, 32], strides = [1, 1]} : vector<7x32xf32> to vector<1x32xf32>
    %181 = vector.shape_cast %180 : vector<1x32xf32> to vector<32xf32>
    %c1_48 = arith.constant 1 : index
    %c0_49 = arith.constant 0 : index
    %c0_50 = arith.constant 0 : index
    %182 = vector.load %arg7[%c1_48, %c0_49, %c0_50] : memref<2x2x64xf32, #tpu.memory_space<vmem>>, vector<1x2x64xf32>
    %183 = vector.shape_cast %182 : vector<1x2x64xf32> to vector<2x64xf32>
    %184 = vector.extract_strided_slice %183 {offsets = [0, 0], sizes = [1, 64], strides = [1, 1]} : vector<2x64xf32> to vector<1x64xf32>
    %185 = vector.shape_cast %184 : vector<1x64xf32> to vector<64xf32>
    %186 = vector.extract_strided_slice %183 {offsets = [1, 0], sizes = [1, 64], strides = [1, 1]} : vector<2x64xf32> to vector<1x64xf32>
    %187 = vector.shape_cast %186 : vector<1x64xf32> to vector<64xf32>
    %cst_51 = arith.constant dense<0.000000e+00> : vector<16xf32>
    %188 = vector.multi_reduction <add>, %158, %cst_51 [1] : vector<16x32xf32> to vector<16xf32>
    %189 = vector.shape_cast %188 : vector<16xf32> to vector<16x1xf32>
    %cst_52 = arith.constant 3.200000e+01 : f32
    %190 = vector.broadcast %cst_52 : f32 to vector<16x1xf32>
    %191 = arith.divf %189, %190 : vector<16x1xf32>
    %192 = vector.broadcast %191 : vector<16x1xf32> to vector<16x32xf32>
    %193 = arith.subf %158, %192 : vector<16x32xf32>
    %194 = arith.mulf %193, %193 : vector<16x32xf32>
    %cst_53 = arith.constant dense<0.000000e+00> : vector<16xf32>
    %195 = vector.multi_reduction <add>, %194, %cst_53 [1] : vector<16x32xf32> to vector<16xf32>
    %196 = vector.shape_cast %195 : vector<16xf32> to vector<16x1xf32>
    %cst_54 = arith.constant 3.100000e+01 : f32
    %197 = vector.broadcast %cst_54 : f32 to vector<16x1xf32>
    %198 = arith.divf %196, %197 : vector<16x1xf32>
    %199 = math.sqrt %198 : vector<16x1xf32>
    %200 = vector.broadcast %191 : vector<16x1xf32> to vector<16x32xf32>
    %201 = arith.subf %158, %200 : vector<16x32xf32>
    %202 = vector.shape_cast %169 : vector<32xf32> to vector<1x32xf32>
    %203 = vector.broadcast %202 : vector<1x32xf32> to vector<16x32xf32>
    %204 = arith.mulf %203, %201 : vector<16x32xf32>
    %cst_55 = arith.constant 9.99999997E-7 : f32
    %205 = vector.broadcast %cst_55 : f32 to vector<16x1xf32>
    %206 = arith.addf %199, %205 : vector<16x1xf32>
    %207 = vector.broadcast %206 : vector<16x1xf32> to vector<16x32xf32>
    %208 = arith.divf %204, %207 : vector<16x32xf32>
    %209 = vector.shape_cast %171 : vector<32xf32> to vector<1x32xf32>
    %210 = vector.broadcast %209 : vector<1x32xf32> to vector<16x32xf32>
    %211 = arith.addf %208, %210 : vector<16x32xf32>
    %cst_56 = arith.constant dense<0.000000e+00> : vector<16x32xf32>
    %212 = tpu.matmul %211, %161, %cst_56 {dimension_numbers = #tpu.dot_dimension_numbers<[1], [0], [0], [1], [0, 0, 1, 1], [], []>} : vector<16x32xf32>, vector<32x32xf32>, vector<16x32xf32> -> vector<16x32xf32>
    %213 = vector.shape_cast %173 : vector<32xf32> to vector<1x32xf32>
    %214 = vector.broadcast %213 : vector<1x32xf32> to vector<16x32xf32>
    %215 = arith.addf %212, %214 : vector<16x32xf32>
    %216 = vector.extract_strided_slice %4 {offsets = [0, 64], sizes = [16, 64], strides = [1, 1]} : vector<16x128xf32> to vector<16x64xf32>
    %217 = vector.shape_cast %185 : vector<64xf32> to vector<1x64xf32>
    %218 = vector.broadcast %217 : vector<1x64xf32> to vector<16x64xf32>
    %219 = arith.addf %216, %218 : vector<16x64xf32>
    %220 = vector.extract_strided_slice %219 {offsets = [0, 0], sizes = [16, 32], strides = [1, 1]} : vector<16x64xf32> to vector<16x32xf32>
    %221 = vector.extract_strided_slice %219 {offsets = [0, 32], sizes = [16, 32], strides = [1, 1]} : vector<16x64xf32> to vector<16x32xf32>
    %222 = vector.extract_strided_slice %215 {offsets = [0, 0], sizes = [16, 8], strides = [1, 1]} : vector<16x32xf32> to vector<16x8xf32>
    %223 = vector.shape_cast %222 : vector<16x8xf32> to vector<2x8x8xf32>
    %224 = vector.extract_strided_slice %215 {offsets = [0, 8], sizes = [16, 8], strides = [1, 1]} : vector<16x32xf32> to vector<16x8xf32>
    %225 = vector.shape_cast %224 : vector<16x8xf32> to vector<2x8x8xf32>
    %226 = vector.extract_strided_slice %215 {offsets = [0, 16], sizes = [16, 8], strides = [1, 1]} : vector<16x32xf32> to vector<16x8xf32>
    %227 = vector.shape_cast %226 : vector<16x8xf32> to vector<2x8x8xf32>
    %228 = vector.extract_strided_slice %215 {offsets = [0, 24], sizes = [16, 8], strides = [1, 1]} : vector<16x32xf32> to vector<16x8xf32>
    %229 = vector.shape_cast %228 : vector<16x8xf32> to vector<2x8x8xf32>
    %230 = tpu.concatenate %223, %225, %227, %229 in 0 : vector<2x8x8xf32>, vector<2x8x8xf32>, vector<2x8x8xf32>, vector<2x8x8xf32> -> vector<8x8x8xf32>
    %231 = vector.extract_strided_slice %220 {offsets = [0, 0], sizes = [16, 8], strides = [1, 1]} : vector<16x32xf32> to vector<16x8xf32>
    %232 = vector.shape_cast %231 : vector<16x8xf32> to vector<2x8x8xf32>
    %233 = vector.extract_strided_slice %220 {offsets = [0, 8], sizes = [16, 8], strides = [1, 1]} : vector<16x32xf32> to vector<16x8xf32>
    %234 = vector.shape_cast %233 : vector<16x8xf32> to vector<2x8x8xf32>
    %235 = vector.extract_strided_slice %220 {offsets = [0, 16], sizes = [16, 8], strides = [1, 1]} : vector<16x32xf32> to vector<16x8xf32>
    %236 = vector.shape_cast %235 : vector<16x8xf32> to vector<2x8x8xf32>
    %237 = vector.extract_strided_slice %220 {offsets = [0, 24], sizes = [16, 8], strides = [1, 1]} : vector<16x32xf32> to vector<16x8xf32>
    %238 = vector.shape_cast %237 : vector<16x8xf32> to vector<2x8x8xf32>
    %239 = tpu.concatenate %232, %234, %236, %238 in 0 : vector<2x8x8xf32>, vector<2x8x8xf32>, vector<2x8x8xf32>, vector<2x8x8xf32> -> vector<8x8x8xf32>
    %240 = vector.extract_strided_slice %221 {offsets = [0, 0], sizes = [16, 8], strides = [1, 1]} : vector<16x32xf32> to vector<16x8xf32>
    %241 = vector.shape_cast %240 : vector<16x8xf32> to vector<2x8x8xf32>
    %242 = vector.extract_strided_slice %221 {offsets = [0, 8], sizes = [16, 8], strides = [1, 1]} : vector<16x32xf32> to vector<16x8xf32>
    %243 = vector.shape_cast %242 : vector<16x8xf32> to vector<2x8x8xf32>
    %244 = vector.extract_strided_slice %221 {offsets = [0, 16], sizes = [16, 8], strides = [1, 1]} : vector<16x32xf32> to vector<16x8xf32>
    %245 = vector.shape_cast %244 : vector<16x8xf32> to vector<2x8x8xf32>
    %246 = vector.extract_strided_slice %221 {offsets = [0, 24], sizes = [16, 8], strides = [1, 1]} : vector<16x32xf32> to vector<16x8xf32>
    %247 = vector.shape_cast %246 : vector<16x8xf32> to vector<2x8x8xf32>
    %248 = tpu.concatenate %241, %243, %245, %247 in 0 : vector<2x8x8xf32>, vector<2x8x8xf32>, vector<2x8x8xf32>, vector<2x8x8xf32> -> vector<8x8x8xf32>
    "tpu.trace_start"() <{level = 10 : i32, message = "bqd,bkd->bqk"}> : () -> ()
    %cst_57 = arith.constant dense<0.000000e+00> : vector<8x8x8xf32>
    %249 = tpu.matmul %230, %239, %cst_57 {dimension_numbers = #tpu.dot_dimension_numbers<[2], [2], [1], [1], [0, 0, 0, 1, 1, 1], [0], [0]>} : vector<8x8x8xf32>, vector<8x8x8xf32>, vector<8x8x8xf32> -> vector<8x8x8xf32>
    "tpu.trace_stop"() : () -> ()
    %cst_58 = arith.constant 0.353553385 : f32
    %250 = vector.broadcast %cst_58 : f32 to vector<8x8x8xf32>
    %251 = arith.mulf %249, %250 : vector<8x8x8xf32>
    %252 = arith.addf %251, %2 : vector<8x8x8xf32>
    %cst_59 = arith.constant dense<0xFF800000> : vector<8x8xf32>
    %253 = vector.multi_reduction <maximumf>, %252, %cst_59 [2] : vector<8x8x8xf32> to vector<8x8xf32>
    %254 = vector.shape_cast %253 : vector<8x8xf32> to vector<8x8x1xf32>
    %255 = vector.broadcast %254 : vector<8x8x1xf32> to vector<8x8x8xf32>
    %256 = arith.subf %252, %255 : vector<8x8x8xf32>
    %257 = math.exp %256 : vector<8x8x8xf32>
    %cst_60 = arith.constant dense<0.000000e+00> : vector<8x8xf32>
    %258 = vector.multi_reduction <add>, %257, %cst_60 [2] : vector<8x8x8xf32> to vector<8x8xf32>
    %259 = vector.shape_cast %258 : vector<8x8xf32> to vector<8x8x1xf32>
    %260 = tpu.reciprocal %259 {approx = true} : vector<8x8x1xf32> -> vector<8x8x1xf32>
    %261 = vector.broadcast %260 : vector<8x8x1xf32> to vector<8x8x8xf32>
    %262 = arith.mulf %257, %261 : vector<8x8x8xf32>
    "tpu.trace_start"() <{level = 10 : i32, message = "bqk,bkd->bqd"}> : () -> ()
    %cst_61 = arith.constant dense<0.000000e+00> : vector<8x8x8xf32>
    %263 = tpu.matmul %262, %248, %cst_61 {dimension_numbers = #tpu.dot_dimension_numbers<[2], [1], [1], [2], [0, 0, 0, 1, 1, 2], [0], [0]>} : vector<8x8x8xf32>, vector<8x8x8xf32>, vector<8x8x8xf32> -> vector<8x8x8xf32>
    "tpu.trace_stop"() : () -> ()
    %264 = vector.extract_strided_slice %263 {offsets = [0, 0, 0], sizes = [2, 8, 8], strides = [1, 1, 1]} : vector<8x8x8xf32> to vector<2x8x8xf32>
    %265 = vector.shape_cast %264 : vector<2x8x8xf32> to vector<16x8xf32>
    %266 = vector.extract_strided_slice %263 {offsets = [2, 0, 0], sizes = [2, 8, 8], strides = [1, 1, 1]} : vector<8x8x8xf32> to vector<2x8x8xf32>
    %267 = vector.shape_cast %266 : vector<2x8x8xf32> to vector<16x8xf32>
    %268 = vector.extract_strided_slice %263 {offsets = [4, 0, 0], sizes = [2, 8, 8], strides = [1, 1, 1]} : vector<8x8x8xf32> to vector<2x8x8xf32>
    %269 = vector.shape_cast %268 : vector<2x8x8xf32> to vector<16x8xf32>
    %270 = vector.extract_strided_slice %263 {offsets = [6, 0, 0], sizes = [2, 8, 8], strides = [1, 1, 1]} : vector<8x8x8xf32> to vector<2x8x8xf32>
    %271 = vector.shape_cast %270 : vector<2x8x8xf32> to vector<16x8xf32>
    %272 = tpu.concatenate %265, %267, %269, %271 in 1 : vector<16x8xf32>, vector<16x8xf32>, vector<16x8xf32>, vector<16x8xf32> -> vector<16x32xf32>
    %cst_62 = arith.constant dense<0.000000e+00> : vector<16x32xf32>
    %273 = tpu.matmul %272, %162, %cst_62 {dimension_numbers = #tpu.dot_dimension_numbers<[1], [0], [0], [1], [0, 0, 1, 1], [], []>} : vector<16x32xf32>, vector<32x32xf32>, vector<16x32xf32> -> vector<16x32xf32>
    %274 = arith.addf %158, %273 : vector<16x32xf32>
    %275 = vector.shape_cast %175 : vector<32xf32> to vector<1x32xf32>
    %276 = vector.broadcast %275 : vector<1x32xf32> to vector<16x32xf32>
    %277 = arith.addf %274, %276 : vector<16x32xf32>
    %cst_63 = arith.constant dense<0.000000e+00> : vector<16xf32>
    %278 = vector.multi_reduction <add>, %277, %cst_63 [1] : vector<16x32xf32> to vector<16xf32>
    %279 = vector.shape_cast %278 : vector<16xf32> to vector<16x1xf32>
    %cst_64 = arith.constant 3.200000e+01 : f32
    %280 = vector.broadcast %cst_64 : f32 to vector<16x1xf32>
    %281 = arith.divf %279, %280 : vector<16x1xf32>
    %282 = vector.broadcast %281 : vector<16x1xf32> to vector<16x32xf32>
    %283 = arith.subf %277, %282 : vector<16x32xf32>
    %284 = arith.mulf %283, %283 : vector<16x32xf32>
    %cst_65 = arith.constant dense<0.000000e+00> : vector<16xf32>
    %285 = vector.multi_reduction <add>, %284, %cst_65 [1] : vector<16x32xf32> to vector<16xf32>
    %286 = vector.shape_cast %285 : vector<16xf32> to vector<16x1xf32>
    %cst_66 = arith.constant 3.100000e+01 : f32
    %287 = vector.broadcast %cst_66 : f32 to vector<16x1xf32>
    %288 = arith.divf %286, %287 : vector<16x1xf32>
    %289 = math.sqrt %288 : vector<16x1xf32>
    %290 = vector.broadcast %281 : vector<16x1xf32> to vector<16x32xf32>
    %291 = arith.subf %277, %290 : vector<16x32xf32>
    %292 = vector.shape_cast %177 : vector<32xf32> to vector<1x32xf32>
    %293 = vector.broadcast %292 : vector<1x32xf32> to vector<16x32xf32>
    %294 = arith.mulf %293, %291 : vector<16x32xf32>
    %cst_67 = arith.constant 9.99999997E-7 : f32
    %295 = vector.broadcast %cst_67 : f32 to vector<16x1xf32>
    %296 = arith.addf %289, %295 : vector<16x1xf32>
    %297 = vector.broadcast %296 : vector<16x1xf32> to vector<16x32xf32>
    %298 = arith.divf %294, %297 : vector<16x32xf32>
    %299 = vector.shape_cast %179 : vector<32xf32> to vector<1x32xf32>
    %300 = vector.broadcast %299 : vector<1x32xf32> to vector<16x32xf32>
    %301 = arith.addf %298, %300 : vector<16x32xf32>
    %cst_68 = arith.constant dense<0.000000e+00> : vector<16x64xf32>
    %302 = tpu.matmul %301, %163, %cst_68 {dimension_numbers = #tpu.dot_dimension_numbers<[1], [0], [0], [1], [0, 0, 1, 1], [], []>} : vector<16x32xf32>, vector<32x64xf32>, vector<16x64xf32> -> vector<16x64xf32>
    %303 = vector.shape_cast %187 : vector<64xf32> to vector<1x64xf32>
    %304 = vector.broadcast %303 : vector<1x64xf32> to vector<16x64xf32>
    %305 = arith.addf %302, %304 : vector<16x64xf32>
    %cst_69 = arith.constant 0.000000e+00 : f32
    %306 = vector.broadcast %cst_69 : f32 to vector<16x64xf32>
    %307 = arith.maximumf %305, %306 : vector<16x64xf32>
    %cst_70 = arith.constant dense<0.000000e+00> : vector<16x32xf32>
    %308 = tpu.matmul %307, %165, %cst_70 {dimension_numbers = #tpu.dot_dimension_numbers<[1], [0], [0], [1], [0, 0, 1, 1], [], []>} : vector<16x64xf32>, vector<64x32xf32>, vector<16x32xf32> -> vector<16x32xf32>
    %309 = arith.addf %277, %308 : vector<16x32xf32>
    %310 = vector.shape_cast %181 : vector<32xf32> to vector<1x32xf32>
    %311 = vector.broadcast %310 : vector<1x32xf32> to vector<16x32xf32>
    %312 = arith.addf %309, %311 : vector<16x32xf32>
    %c0_71 = arith.constant 0 : index
    %c0_72 = arith.constant 0 : index
    %313 = vector.load %arg8[%c0_71, %c0_72] : memref<2x32xf32, #tpu.memory_space<vmem>>, vector<1x32xf32>
    %314 = vector.shape_cast %313 : vector<1x32xf32> to vector<32xf32>
    %c1_73 = arith.constant 1 : index
    %c0_74 = arith.constant 0 : index
    %315 = vector.load %arg8[%c1_73, %c0_74] : memref<2x32xf32, #tpu.memory_space<vmem>>, vector<1x32xf32>
    %316 = vector.shape_cast %315 : vector<1x32xf32> to vector<32xf32>
    %cst_75 = arith.constant dense<0.000000e+00> : vector<16xf32>
    %317 = vector.multi_reduction <add>, %312, %cst_75 [1] : vector<16x32xf32> to vector<16xf32>
    %318 = vector.shape_cast %317 : vector<16xf32> to vector<16x1xf32>
    %cst_76 = arith.constant 3.200000e+01 : f32
    %319 = vector.broadcast %cst_76 : f32 to vector<16x1xf32>
    %320 = arith.divf %318, %319 : vector<16x1xf32>
    %321 = vector.broadcast %320 : vector<16x1xf32> to vector<16x32xf32>
    %322 = arith.subf %312, %321 : vector<16x32xf32>
    %323 = arith.mulf %322, %322 : vector<16x32xf32>
    %cst_77 = arith.constant dense<0.000000e+00> : vector<16xf32>
    %324 = vector.multi_reduction <add>, %323, %cst_77 [1] : vector<16x32xf32> to vector<16xf32>
    %325 = vector.shape_cast %324 : vector<16xf32> to vector<16x1xf32>
    %cst_78 = arith.constant 3.100000e+01 : f32
    %326 = vector.broadcast %cst_78 : f32 to vector<16x1xf32>
    %327 = arith.divf %325, %326 : vector<16x1xf32>
    %328 = math.sqrt %327 : vector<16x1xf32>
    %329 = vector.broadcast %320 : vector<16x1xf32> to vector<16x32xf32>
    %330 = arith.subf %312, %329 : vector<16x32xf32>
    %331 = vector.shape_cast %314 : vector<32xf32> to vector<1x32xf32>
    %332 = vector.broadcast %331 : vector<1x32xf32> to vector<16x32xf32>
    %333 = arith.mulf %332, %330 : vector<16x32xf32>
    %cst_79 = arith.constant 9.99999997E-7 : f32
    %334 = vector.broadcast %cst_79 : f32 to vector<16x1xf32>
    %335 = arith.addf %328, %334 : vector<16x1xf32>
    %336 = vector.broadcast %335 : vector<16x1xf32> to vector<16x32xf32>
    %337 = arith.divf %333, %336 : vector<16x32xf32>
    %338 = vector.shape_cast %316 : vector<32xf32> to vector<1x32xf32>
    %339 = vector.broadcast %338 : vector<1x32xf32> to vector<16x32xf32>
    %340 = arith.addf %337, %339 : vector<16x32xf32>
    %c0_80 = arith.constant 0 : index
    %c0_81 = arith.constant 0 : index
    %341 = vector.load %arg9[%c0_80, %c0_81] : memref<16x32xf32, #tpu.memory_space<vmem>>, vector<16x32xf32>
    tpu.vector_store %arg9[%c0_80, %c0_81], %340 {strides = array<i32>} : memref<16x32xf32, #tpu.memory_space<vmem>>, vector<16x32xf32>,
    return
  }
}

</mosaic_0001>

<bundles_post_ra>
// kernel: decoder_forward.1
= control target key start
LH: loop header
LB: loop body
LE: loop exit
PB: predicated region body
PF: predicated region fallthrough
CT: control target
= control target key end

     0   :  { %vm49_vm0 = vcmask 261120   ;;  %s5555_s0 = inlined_call_operand.vmem [shape: f32[16,32], index: 0, kind: input, shape index: {}]   ;;  %s5556_s1 = inlined_call_operand.vmem [shape: f32[16,32], index: 1, kind: input, shape index: {}]   ;;  %s5557_s2 = inlined_call_operand.vmem [shape: f32[8,8,8], index: 2, kind: input, shape index: {}]   ;;  %s5558_s3 = inlined_call_operand.vmem [shape: f32[32,128], index: 3, kind: input, shape index: {}]   ;;  %s5559_s4 = inlined_call_operand.vmem [shape: f32[2,32,128], index: 4, kind: input, shape index: {}]   ;;  %s5560_s5 = inlined_call_operand.vmem [shape: f32[2,64,32], index: 5, kind: input, shape index: {}]   ;;  %s5561_s6 = inlined_call_operand.vmem [shape: f32[2,7,32], index: 6, kind: input, shape index: {}]   ;;  %s5562_s7 = inlined_call_operand.vmem [shape: f32[2,2,64], index: 7, kind: input, shape index: {}]   ;;  %s5563_s8 = inlined_call_operand.vmem [shape: f32[2,32], index: 8, kind: input, shape index: {}]   ;;  %s5564_s9 = inlined_call_operand.hbm [shape: f32[16,32], index: 9, kind: output, shape index: {}]  }
   0x1   :  { %v4785_v0 = vld [vmem:[%s5555_s0] sm:$0xff]  ;;  %v4790_v1 = vld [vmem:[%s5555_s0 + $0x8] sm:$0xff] }
   0x2   :  { %14 = vsyncpa [#allocation3], 0  ;;  %v145_v2 = vsel %vm49_vm0, %v4785_v0, 0.0  ;;  %v148_v3 = vsel %vm49_vm0, %v4790_v1, 0.0  ;;  %v45_v14 = vld [vmem:[%s5558_s3] sm:$0xff]  ;;  %v46_v15 = vld [vmem:[%s5558_s3 + $0x8] sm:$0xff]  ;;  %v181_v34 = vlaneseq }
   0x3   :  { %146 = vadd.xlane.f32.xlu0 %v145_v2  ;;  %v4444_v16 = vpack.c.bf16 %v46_v15, %v45_v14  ;;  %v47_v17 = vld [vmem:[%s5558_s3 + $0x10] sm:$0xff]  ;;  %v48_v18 = vld [vmem:[%s5558_s3 + $0x18] sm:$0xff]  ;;  %v35_v20 = vld [vmem:[%s5556_s1] sm:$0xff]  ;;  %v4719_v28 = vmov 0.0   ;;  %vm318_vm5 = vcmask 64512   ;;  %s4720_s0 = smov 120  }
   0x4   :  { %v4448_v19 = vpack.c.bf16 %v48_v18, %v47_v17  ;;  %4177 = vmatprep.mubr.msk.f32.mxu1 %vm49_vm0, %v35_v20  ;;  %v36_v21 = vld [vmem:[%s5556_s1 + $0x8] sm:$0xff]  ;;  %v4831_v22 = vld [vmem:[%s5559_s4] sm:$0xff]  ;;  %v4841_v24 = vld [vmem:[%s5559_s4 + $0x10] sm:$0xff]  ;;  %4191 = vmatprep.subr.mxu0 %v4719_v28  ;;  %v4854_v39 = vshrl.u32 %v181_v34, 7  ;;  %s4721_s13 = smov 112   ;;  %s4722_s14 = smov 104  }
   0x5   :  { %4445 = vmatprep.subr.bf16.mxu1 %v4444_v16  ;;  %v4836_v23 = vld [vmem:[%s5559_s4 + $0x8] sm:$0xff]  ;;  %v4848_v26 = vld [vmem:[%s5559_s4 + $0x18] sm:$0xff]  ;;  %v4862_v47 = vld [vmem:[%s5561_s6] sm:$0x7f]  ;;  %vm4723_vm6 = vmmov 0   ;;  %s4724_s29 = smov 96  }
   0x6   :  { %4447 = vmatpush3.bf16.msra.mxu1 %v4444_v16  ;;  %v4452_v25 = vpack.c.bf16 %v4836_v23, %v4831_v22  ;;  %v4456_v27 = vpack.c.bf16 %v4848_v26, %v4841_v24  ;;  %v4857_v45 = vsub.s32 0, %v4854_v39  ;;  %v4867_v50 = vsub.s32 1, %v4854_v39  ;;  %v4878_v60 = vld [vmem:[%s5562_s7] sm:$0x3]  ;;  %4193 = vmatprep.mubr.msk.f32.mxu0 %vm4723_vm6, %v4719_v28  ;;  %s4725_s30 = smov 8   ;;  %s4726_s10 = smov 16  }
   0x7   :  { %149 = vadd.xlane.f32.xlu0 %v148_v3  ;;  %4449 = vmatprep.subr.bf16.mxu1 %v4448_v19  ;;  %s4727_s11 = smov 24   ;;  %vm1649_vm7 = vcmask 130048   ;;  %vm1652_vm8 = vcmask 195584   ;;  %s4728_s12 = smov 64   ;;  %vm1911_vm13 = vcmask 523264  }
   0x8   :  { %v184_v49 = vrot.slane %v4862_v47, %v4857_v45  ;;  %v196_v52 = vrot.slane %v4862_v47, %v4867_v50  ;;  %v287_v61 = vrot.slane %v4878_v60, %v4857_v45  ;;  %s4729_s17 = smov 32   ;;  %s4730_s3 = smov [#allocation2]  }
   0x9   :  { %s3950_s26 = sshll.u32 %s4730_s3, 4  ;;  %s3951_s26 = int_to_ptr.vmem [resolvable:$true] %s3950_s26 }
   0xa   :  { %4451 = vmatpush3.bf16.msra.mxu1 %v4448_v19  ;;  %s4695_s27 = scalar_lea.vmem %s3951_s26, 256  ;;  %p4700_p1 = scmp.lt.s32.totalorder %s3951_s26, %s3951_s26 }
   0xb   :  { %4453 = vmatprep.subr.bf16.mxu1 %v4452_v25  ;;  %p4696_p0 = scmp.ne.s32.totalorder %s3951_s26, %s4695_s27  ;;  %p4701_p2 = scmp.lt.s32.totalorder %s4695_s27, %s4695_s27 }
   0xd   :  { %4178 = vmatmul.mubr.msk.f32.vlgmr.msra.gmra.mrb[0].mxu1 %vm49_vm0, %v36_v21  ;;  %p4702_p3 = por %p4701_p2, %p4700_p1 }
   0xe   :  { %4455 = vmatpush3.bf16.msra.mxu1 %v4452_v25 }
   0xf   :  { %4457 = vmatprep.subr.bf16.mxu1 %v4456_v27  ;;  %p4703_p4 = pnand %p4702_p3, %p4696_p0 }
  0x12   :  { %4459 = vmatpush3.bf16.msra.mxu1 %v4456_v27  ;;  %v38_v27 = vld [vmem:[%s5557_s2 + $0x8] sm:$0xff] }
  0x13   :  { %4196 = vmatprep.subr.mxu1 %v4719_v28 }
  0x90   :  { %v147_v4 = vpop.xlane.xlu0 %146 }
  0x91   :  { %v152_v5 = vmul.f32 0.03125, %v147_v4  ;;  %v201_v4 = vsub.s32 2, %v4854_v39 }
  0x93   :  { %v4797_v6 = vsub.f32 %v4785_v0, %v152_v5  ;;  %v202_v5 = vrot.slane %v4862_v47, %v201_v4 }
  0x94   :  { %v150_v7 = vpop.xlane.xlu0 %149 }
  0x95   :  { %v153_v8 = vmul.f32 0.03125, %v150_v7  ;;  %v156_v9 = vmul.f32 %v4797_v6, %v4797_v6  ;;  %v185_v51 = vmul.f32 %v184_v49, %v4797_v6 }
  0x97   :  { %v4802_v10 = vsub.f32 %v4790_v1, %v153_v8  ;;  %v158_v11 = vsel %vm49_vm0, %v156_v9, 0.0 }
  0x98   :  { %159 = vadd.xlane.f32.xlu1 %v158_v11 }
  0x99   :  { %v157_v12 = vmul.f32 %v4802_v10, %v4802_v10  ;;  %v186_v55 = vmul.f32 %v184_v49, %v4802_v10 }
  0x9b   :  { %v161_v13 = vsel %vm49_vm0, %v157_v12, 0.0 }
  0x9c   :  { %162 = vadd.xlane.f32.xlu1 %v161_v13 }
  0xe0   :  { %v4882_v62 = vpop.f32.mrb[0].mxu1 }
  0xe1   :  { %v4885_v63 = vadd.f32 %v4882_v62, %v287_v61  ;;  %v4887_v2 = vpop.f32.mrb[1].mxu1 }
  0xe2   :  { %v4890_v3 = vadd.f32 %v287_v61, %v4887_v2 }
  0xe3   :  { %308 = vrot.lane.b32.xlu1 %v4885_v63, %s4720_s0 }
  0xe4   :  { %306 = vrot.lane.b32.xlu0 %v4890_v3, %s4720_s0  ;;  %4192 = vmatpush3.xpose.msk.msra.mxu0 %vm318_vm5, %v4890_v3 }
  0xe5   :  { %4201 = vmatprep.subr.mxu0 %v4719_v28 }
  0xe7   :  { %312 = vrot.lane.b32.xlu1 %v4885_v63, %s4721_s13 }
  0xe8   :  { %310 = vrot.lane.b32.xlu0 %v4890_v3, %s4721_s13 }
  0xec   :  { %314 = vrot.lane.b32.xlu0 %v4890_v3, %s4722_s14 }
 0x125   :  { %v160_v29 = vpop.xlane.xlu1 %159 }
 0x126   :  { %v165_v30 = vmul.f32 0.032258064, %v160_v29 }
 0x128   :  { %4585 = vrsqrt.f32 %v165_v30  ;;  %vm169_vm1 = vcmp.eq.f32.partialorder %v165_v30, inf  ;;  %v172_v36 = vand.u32 2147483648, %v165_v30  ;;  %vm171_vm2 = vcmp.eq.f32.partialorder %v165_v30, 0.0 }
 0x129   :  { %v163_v31 = vpop.xlane.xlu1 %162 }
 0x12a   :  { %v166_v32 = vmul.f32 0.032258064, %v163_v31 }
 0x12c   :  { %4587 = vrsqrt.f32 %v166_v32  ;;  %vm176_vm3 = vcmp.eq.f32.partialorder %v166_v32, inf  ;;  %v179_v43 = vand.u32 2147483648, %v166_v32  ;;  %vm178_vm4 = vcmp.eq.f32.partialorder %v166_v32, 0.0 }
 0x132   :  { %v4586_v33 = vpop.eup %4585 }
 0x133   :  { %v168_v35 = vmul.f32 %v4586_v33, %v165_v30 }
 0x135   :  { %v170_v37 = vsel %vm169_vm1, %v165_v30, %v168_v35 }
 0x136   :  { %v4588_v38 = vpop.eup %4587  ;;  %v173_v40 = vsel %vm171_vm2, %v172_v36, %v170_v37 }
 0x137   :  { %v175_v41 = vmul.f32 %v4588_v38, %v166_v32  ;;  %v187_v42 = vadd.f32 1e-06, %v173_v40 }
 0x139   :  { %v177_v44 = vsel %vm176_vm3, %v166_v32, %v175_v41  ;;  %4589 = vrcp.f32 %v187_v42  ;;  %v4984_v32 = vld [vmem:[%s5557_s2] sm:$0xff]  ;;  %v40_v41 = vld [vmem:[%s5557_s2 + $0x18] sm:$0xff] }
 0x13a   :  { %v180_v46 = vsel %vm178_vm4, %v179_v43, %v177_v44 }
 0x13b   :  { %v188_v48 = vadd.f32 1e-06, %v180_v46 }
 0x13d   :  { %4591 = vrcp.f32 %v188_v48  ;;  %v39_v48 = vld [vmem:[%s5557_s2 + $0x10] sm:$0xff] }
 0x143   :  { %v4590_v53 = vpop.eup %4589 }
 0x144   :  { %v190_v54 = vmul.f32 %v4590_v53, %v185_v51 }
 0x146   :  { %v197_v56 = vadd.f32 %v196_v52, %v190_v54 }
 0x147   :  { %v4592_v57 = vpop.eup %4591 }
 0x148   :  { %v192_v58 = vmul.f32 %v4592_v57, %v186_v55  ;;  %4188 = vmatprep.mubr.msk.f32.mxu1 %vm49_vm0, %v197_v56  ;;  %v42_v56 = vld [vmem:[%s5557_s2 + $0x28] sm:$0xff]  ;;  %v41_v57 = vld [vmem:[%s5557_s2 + $0x20] sm:$0xff] }
 0x14a   :  { %v198_v59 = vadd.f32 %v196_v52, %v192_v58 }
 0x14c   :  { %4189 = vmatmul.mubr.msk.f32.vlgmr.msra.gmra.mrb[2].mxu1 %vm49_vm0, %v198_v59 }
 0x14d   :  { %4197 = vmatpush3.xpose.msk.msra.mxu1 %vm318_vm5, %v4885_v63  ;;  %4198 = vmatprep.mubr.msk.f32.mxu1 %vm4723_vm6, %v4719_v28 }
 0x14e   :  { %4206 = vmatprep.subr.mxu1 %v4719_v28 }
 0x155   :  { %v4922_v11 = vpop.permute.xlu1 %308 }
 0x156   :  { %v4920_v10 = vpop.permute.xlu0 %306 }
 0x159   :  { %v4942_v13 = vpop.permute.xlu1 %312 }
 0x15a   :  { %v4940_v12 = vpop.permute.xlu0 %310 }
 0x15e   :  { %v4945_v15 = vpop.permute.xlu0 %314 }
 0x21f   :  { %v4190_v6 = vpop.f32.mrb[2].mxu1 }
 0x220   :  { %v281_v7 = vadd.f32 %v4190_v6, %v202_v5  ;;  %v275_v8 = vpop.f32.mrb[3].mxu1 }
 0x221   :  { %v276_v9 = vadd.f32 %v275_v8, %v202_v5 }
 0x222   :  { %294 = vrot.lane.b32.xlu1 %v281_v7, %s4720_s0  ;;  %4199 = vmatmul.mubr.msk.f32.vlgmr.msra.gmra.mrb[4].mxu1 %vm318_vm5, %v281_v7 }
 0x223   :  { %296 = vrot.lane.b32.xlu0 %v276_v9, %s4721_s13  ;;  %4194 = vmatmul.mubr.msk.f32.vlgmr.msra.gmra.mrb[0].mxu0 %vm318_vm5, %v276_v9 }
 0x224   :  { %4202 = vmatpush3.xpose.msk.msra.mxu0 %vm318_vm5, %v4920_v10  ;;  %4207 = vmatpush3.xpose.msk.msra.mxu1 %vm318_vm5, %v4922_v11 }
 0x225   :  { %4208 = vmatprep.mubr.msk.f32.mxu1 %vm4723_vm6, %v4719_v28  ;;  %4216 = vmatprep.subr.mxu1 %v4719_v28 }
 0x226   :  { %292 = vrot.lane.b32.xlu1 %v276_v9, %s4720_s0  ;;  %4203 = vmatprep.mubr.msk.f32.mxu0 %vm4723_vm6, %v4719_v28 }
 0x227   :  { %300 = vrot.lane.b32.xlu0 %v276_v9, %s4722_s14  ;;  %4211 = vmatprep.subr.mxu0 %v4719_v28 }
 0x22a   :  { %298 = vrot.lane.b32.xlu1 %v281_v7, %s4721_s13 }
 0x22e   :  { %316 = vrot.lane.b32.xlu1 %v4885_v63, %s4722_s14 }
 0x232   :  { %302 = vrot.lane.b32.xlu1 %v281_v7, %s4722_s14 }
 0x294   :  { %v295_v14 = vpop.permute.xlu1 %294 }
 0x295   :  { %4209 = vmatmul.mubr.msk.f32.vlgmr.msra.gmra.mrb[6].mxu1 %vm318_vm5, %v295_v14  ;;  %v297_v17 = vpop.permute.xlu0 %296  ;;  %v43_v14 = vld [vmem:[%s5557_s2 + $0x30] sm:$0xff] }
 0x296   :  { %4217 = vmatpush3.xpose.msk.msra.mxu1 %vm318_vm5, %v4942_v13  ;;  %4218 = vmatprep.mubr.msk.f32.mxu1 %vm4723_vm6, %v4719_v28 }
 0x297   :  { %4226 = vmatprep.subr.mxu1 %v4719_v28 }
 0x298   :  { %v293_v16 = vpop.permute.xlu1 %292 }
 0x299   :  { %4204 = vmatmul.mubr.msk.f32.vlgmr.msra.gmra.mrb[2].mxu0 %vm318_vm5, %v293_v16  ;;  %v301_v19 = vpop.permute.xlu0 %300 }
 0x29a   :  { %4212 = vmatpush3.xpose.msk.msra.mxu0 %vm318_vm5, %v4940_v12  ;;  %4213 = vmatprep.mubr.msk.f32.mxu0 %vm4723_vm6, %v4719_v28 }
 0x29b   :  { %4221 = vmatprep.subr.mxu0 %v4719_v28 }
 0x29c   :  { %v299_v18 = vpop.permute.xlu1 %298 }
 0x29d   :  { %4214 = vmatmul.mubr.msk.f32.vlgmr.msra.gmra.mrb[4].mxu0 %vm318_vm5, %v297_v17  ;;  %4219 = vmatmul.mubr.msk.f32.vlgmr.msra.gmra.mrb[8].mxu1 %vm318_vm5, %v299_v18 }
 0x29e   :  { %4222 = vmatpush3.xpose.msk.msra.mxu0 %vm318_vm5, %v4945_v15  ;;  %4223 = vmatprep.mubr.msk.f32.mxu0 %vm4723_vm6, %v4719_v28 }
 0x29f   :  { %4228 = vmatprep.mubr.msk.f32.mxu1 %vm4723_vm6, %v4719_v28  ;;  %4231 = vmatprep.subr.mxu0 %v4719_v28 }
 0x2a0   :  { %v4967_v20 = vpop.permute.xlu1 %316 }
 0x2a1   :  { %4224 = vmatmul.mubr.msk.f32.vlgmr.msra.gmra.mrb[6].mxu0 %vm318_vm5, %v301_v19  ;;  %4227 = vmatpush3.xpose.msk.msra.mxu1 %vm318_vm5, %v4967_v20 }
 0x2a2   :  { %4236 = vmatprep.subr.mxu1 %v4719_v28  ;;  %4233 = vmatprep.mubr.msk.f32.mxu0 %vm4723_vm6, %v4719_v28 }
 0x2a4   :  { %v303_v21 = vpop.permute.xlu1 %302 }
 0x2a5   :  { %4229 = vmatmul.mubr.msk.f32.vlgmr.msra.gmra.mrb[10].mxu1 %vm318_vm5, %v303_v21 }
 0x2a6   :  { %4238 = vmatprep.mubr.msk.f32.mxu1 %vm4723_vm6, %v4719_v28 }
 0x2f5   :  { %v463_v25 = vpop.f32.mrb[4].mxu1 }
 0x2f6   :  { %v912_v29 = vmul.f32 0.35355338, %v463_v25  ;;  %v389_v30 = vpop.f32.mrb[0].mxu0  ;;  %v4200_v31 = vpop.f32.mrb[5].mxu1 }
 0x2f7   :  { %v911_v33 = vmul.f32 0.35355338, %v389_v30  ;;  %v4195_v34 = vpop.f32.mrb[1].mxu0 }
 0x2f8   :  { %v920_v35 = vadd.f32 %v912_v29, %v38_v27  ;;  %v5011_v27 = vld [vmem:[%s5557_s2 + $0x38] sm:$0xff] }
 0x2f9   :  { %v919_v36 = vadd.f32 %v911_v33, %v4984_v32 }
 0x2fa   :  { %v930_v37 = vsel %vm318_vm5, %v920_v35, -inf }
 0x2fb   :  { %931 = vmax.xlane.f32.xlu1 %v930_v37  ;;  %v927_v38 = vsel %vm318_vm5, %v919_v36, -inf }
 0x2fc   :  { %928 = vmax.xlane.f32.xlu0 %v927_v38 }
 0x368   :  { %v611_v40 = vpop.f32.mrb[6].mxu1 }
 0x369   :  { %v914_v42 = vmul.f32 0.35355338, %v611_v40  ;;  %v4210_v43 = vpop.f32.mrb[7].mxu1 }
 0x36b   :  { %v922_v44 = vadd.f32 %v914_v42, %v40_v41 }
 0x36c   :  { %v537_v46 = vpop.f32.mrb[2].mxu0 }
 0x36d   :  { %v913_v49 = vmul.f32 0.35355338, %v537_v46  ;;  %v4205_v51 = vpop.f32.mrb[3].mxu0  ;;  %v936_v52 = vsel %vm318_vm5, %v922_v44, -inf }
 0x36e   :  { %937 = vmax.xlane.f32.xlu0 %v936_v52 }
 0x36f   :  { %v921_v53 = vadd.f32 %v913_v49, %v39_v48 }
 0x370   :  { %v685_v54 = vpop.f32.mrb[4].mxu0  ;;  %v759_v55 = vpop.f32.mrb[8].mxu1 }
 0x371   :  { %v915_v58 = vmul.f32 0.35355338, %v685_v54  ;;  %v916_v59 = vmul.f32 0.35355338, %v759_v55  ;;  %v4215_v61 = vpop.f32.mrb[5].mxu0  ;;  %v4220_v5 = vpop.f32.mrb[9].mxu1 }
 0x372   :  { %v933_v6 = vsel %vm318_vm5, %v921_v53, -inf }
 0x373   :  { %934 = vmax.xlane.f32.xlu0 %v933_v6  ;;  %v924_v7 = vadd.f32 %v916_v59, %v42_v56  ;;  %v923_v8 = vadd.f32 %v915_v58, %v41_v57 }
 0x374   :  { %v833_v9 = vpop.f32.mrb[6].mxu0 }
 0x375   :  { %v917_v16 = vmul.f32 0.35355338, %v833_v9  ;;  %v4225_v17 = vpop.f32.mrb[7].mxu0  ;;  %v942_v18 = vsel %vm318_vm5, %v924_v7, -inf  ;;  %v939_v19 = vsel %vm318_vm5, %v923_v8, -inf }
 0x376   :  { %943 = vmax.xlane.f32.xlu1 %v942_v18 }
 0x377   :  { %940 = vmax.xlane.f32.xlu0 %v939_v19  ;;  %v925_v21 = vadd.f32 %v917_v16, %v43_v14 }
 0x378   :  { %v907_v25 = vpop.f32.mrb[10].mxu1 }
 0x379   :  { %v918_v29 = vmul.f32 0.35355338, %v907_v25  ;;  %v4230_v30 = vpop.f32.mrb[11].mxu1  ;;  %v945_v31 = vsel %vm318_vm5, %v925_v21, -inf }
 0x37b   :  { %946 = vmax.xlane.f32.xlu0 %v945_v31  ;;  %v926_v33 = vadd.f32 %v918_v29, %v5011_v27 }
 0x37d   :  { %v948_v34 = vsel %vm318_vm5, %v926_v33, -inf }
 0x37e   :  { %949 = vmax.xlane.f32.xlu1 %v948_v34 }
 0x388   :  { %v932_v41 = vpop.xlane.xlu1 %931 }
 0x389   :  { %v929_v37 = vpop.xlane.xlu0 %928 }
 0x38a   :  { %v951_v38 = vsub.f32 %v919_v36, %v929_v37 }
 0x38c   :  { %v959_v40 = vmul.f32 1.442695, %v951_v38 }
 0x38e   :  { %4593 = vpow2.f32 %v959_v40 }
 0x38f   :  { %1091 = vrot.lane.b32.xlu1 %v4885_v63, %s4724_s29  ;;  %v952_v63 = vsub.f32 %v920_v35, %v932_v41 }
 0x391   :  { %1015 = vrot.lane.b32.xlu0 %v4890_v3, %s4724_s29  ;;  %v961_v42 = vmul.f32 1.442695, %v952_v63 }
 0x393   :  { %1167 = vrot.lane.b32.xlu1 %v4920_v10, %s4724_s29  ;;  %4595 = vpow2.f32 %v961_v42 }
 0x395   :  { %1319 = vrot.lane.b32.xlu0 %v4940_v12, %s4724_s29 }
 0x397   :  { %1243 = vrot.lane.b32.xlu1 %v4922_v11, %s4724_s29 }
 0x398   :  { %v5028_v3 = vpop.eup %4593 }
 0x399   :  { %v975_v10 = vsel %vm318_vm5, %v5028_v3, 0.0 }
 0x39b   :  { %1395 = vrot.lane.b32.xlu1 %v4942_v13, %s4724_s29 }
 0x39d   :  { %v5032_v12 = vpop.eup %4595 }
 0x39e   :  { %v978_v11 = vsel %vm318_vm5, %v5032_v12, 0.0 }
 0x3b4   :  { %976 = vadd.xlane.f32.xlu0 %v975_v10 }
 0x3bf   :  { %979 = vadd.xlane.f32.xlu1 %v978_v11 }
 0x3fb   :  { %v938_v13 = vpop.xlane.xlu0 %937 }
 0x3fc   :  { %v954_v36 = vsub.f32 %v922_v44, %v938_v13 }
 0x3fe   :  { %v965_v43 = vmul.f32 1.442695, %v954_v36 }
 0x400   :  { %4597 = vpow2.f32 %v965_v43  ;;  %v935_v46 = vpop.xlane.xlu0 %934 }
 0x401   :  { %v953_v35 = vsub.f32 %v921_v53, %v935_v46 }
 0x403   :  { %v963_v48 = vmul.f32 1.442695, %v953_v35  ;;  %v944_v49 = vpop.xlane.xlu1 %943 }
 0x404   :  { %v956_v51 = vsub.f32 %v924_v7, %v944_v49  ;;  %v941_v52 = vpop.xlane.xlu0 %940 }
 0x405   :  { %4599 = vpow2.f32 %v963_v48  ;;  %v955_v54 = vsub.f32 %v923_v8, %v941_v52 }
 0x406   :  { %v969_v55 = vmul.f32 1.442695, %v956_v51 }
 0x407   :  { %v967_v56 = vmul.f32 1.442695, %v955_v54 }
 0x408   :  { %4601 = vpow2.f32 %v969_v55  ;;  %v947_v57 = vpop.xlane.xlu0 %946  ;;  %v5074_v55 = vpack.i.bf16 %v4848_v26, %v4841_v24 }
 0x409   :  { %4603 = vpow2.f32 %v967_v56  ;;  %v957_v58 = vsub.f32 %v925_v21, %v947_v57 }
 0x40a   :  { %v4598_v59 = vpop.eup %4597 }
 0x40b   :  { %v971_v61 = vmul.f32 1.442695, %v957_v58  ;;  %v950_v5 = vpop.xlane.xlu1 %949  ;;  %v984_v44 = vsel %vm318_vm5, %v4598_v59, 0.0 }
 0x40c   :  { %v958_v6 = vsub.f32 %v926_v33, %v950_v5  ;;  %v1016_v9 = vpop.permute.xlu0 %1015  ;;  %985 = vadd.xlane.f32.xlu1 %v984_v44 }
 0x40d   :  { %4605 = vpow2.f32 %v971_v61  ;;  %4232 = vmatpush3.msra.mxu0 %v1016_v9 }
 0x40e   :  { %v973_v53 = vmul.f32 1.442695, %v958_v6  ;;  %4241 = vmatprep.subr.mxu0 %v4719_v28 }
 0x40f   :  { %v4600_v7 = vpop.eup %4599  ;;  %v1092_v8 = vpop.permute.xlu1 %1091 }
 0x410   :  { %4607 = vpow2.f32 %v973_v53  ;;  %4237 = vmatpush3.msra.mxu1 %v1092_v8  ;;  %v981_v14 = vsel %vm318_vm5, %v4600_v7, 0.0  ;;  %v1320_v33 = vpop.permute.xlu0 %1319 }
 0x411   :  { %982 = vadd.xlane.f32.xlu0 %v981_v14  ;;  %4246 = vmatprep.subr.mxu1 %v4719_v28 }
 0x412   :  { %v4602_v16 = vpop.eup %4601 }
 0x413   :  { %v4604_v17 = vpop.eup %4603  ;;  %v990_v18 = vsel %vm318_vm5, %v4602_v16, 0.0  ;;  %v1168_v31 = vpop.permute.xlu1 %1167 }
 0x414   :  { %991 = vadd.xlane.f32.xlu1 %v990_v18  ;;  %v987_v19 = vsel %vm318_vm5, %v4604_v17, 0.0 }
 0x415   :  { %988 = vadd.xlane.f32.xlu0 %v987_v19 }
 0x417   :  { %v5042_v21 = vpop.eup %4605  ;;  %v1244_v37 = vpop.permute.xlu1 %1243 }
 0x418   :  { %v993_v25 = vsel %vm318_vm5, %v5042_v21, 0.0 }
 0x419   :  { %994 = vadd.xlane.f32.xlu0 %v993_v25 }
 0x41a   :  { %v5046_v29 = vpop.eup %4607 }
 0x41b   :  { %v996_v30 = vsel %vm318_vm5, %v5046_v29, 0.0  ;;  %v1396_v38 = vpop.permute.xlu1 %1395 }
 0x41c   :  { %997 = vadd.xlane.f32.xlu1 %v996_v30 }
 0x42d   :  { %1547 = vrot.lane.b32.xlu1 %v4967_v20, %s4724_s29 }
 0x42f   :  { %1471 = vrot.lane.b32.xlu0 %v4945_v15, %s4724_s29 }
 0x431   :  { %4551 = vrot.lane.b32.xlu1 %v5074_v55, %s4724_s29 }
 0x441   :  { %v977_v34 = vpop.xlane.xlu0 %976 }
 0x442   :  { %4609 = vrcp.f32 %v977_v34 }
 0x44c   :  { %v4610_v40 = vpop.eup %4609  ;;  %v980_v41 = vpop.xlane.xlu1 %979 }
 0x44d   :  { %v1007_v63 = vmul.f32 %v4610_v40, %v5028_v3  ;;  %4611 = vrcp.f32 %v980_v41 }
 0x44f   :  { %4234 = vmatmul.mubr.msk.f32.vlgmr.msra.gmra.mrb[8].mxu0 %vm318_vm5, %v1007_v63 }
 0x450   :  { %4242 = vmatpush3.msra.mxu0 %v1168_v31  ;;  %4243 = vmatprep.mubr.msk.f32.mxu0 %vm4723_vm6, %v4719_v28 }
 0x451   :  { %4251 = vmatprep.subr.mxu0 %v4719_v28 }
 0x457   :  { %v4612_v15 = vpop.eup %4611 }
 0x458   :  { %v1008_v20 = vmul.f32 %v4612_v15, %v5032_v12 }
 0x45a   :  { %4239 = vmatmul.mubr.msk.f32.vlgmr.msra.gmra.mrb[12].mxu1 %vm318_vm5, %v1008_v20 }
 0x45b   :  { %4247 = vmatpush3.msra.mxu1 %v1244_v37  ;;  %4248 = vmatprep.mubr.msk.f32.mxu1 %vm4723_vm6, %v4719_v28 }
 0x45c   :  { %4256 = vmatprep.subr.mxu1 %v4719_v28 }
 0x499   :  { %v986_v42 = vpop.xlane.xlu1 %985 }
 0x49a   :  { %4613 = vrcp.f32 %v986_v42 }
 0x49e   :  { %v983_v3 = vpop.xlane.xlu0 %982 }
 0x49f   :  { %4615 = vrcp.f32 %v983_v3 }
 0x4a1   :  { %v992_v10 = vpop.xlane.xlu1 %991 }
 0x4a2   :  { %4617 = vrcp.f32 %v992_v10  ;;  %v989_v11 = vpop.xlane.xlu0 %988 }
 0x4a3   :  { %4619 = vrcp.f32 %v989_v11 }
 0x4a4   :  { %v4614_v13 = vpop.eup %4613 }
 0x4a5   :  { %v1010_v36 = vmul.f32 %v4614_v13, %v4598_v59  ;;  %v5090_v59 = vpack.i.bf16 %v4836_v23, %v4831_v22 }
 0x4a6   :  { %v995_v43 = vpop.xlane.xlu0 %994 }
 0x4a7   :  { %4621 = vrcp.f32 %v995_v43  ;;  %4249 = vmatmul.mubr.msk.f32.vlgmr.msra.gmra.mrb[14].mxu1 %vm318_vm5, %v1010_v36  ;;  %4546 = vrot.lane.b32.xlu0 %v5090_v59, %s4724_s29 }
 0x4a8   :  { %4257 = vmatpush3.msra.mxu1 %v1396_v38  ;;  %4258 = vmatprep.mubr.msk.f32.mxu1 %vm4723_vm6, %v4719_v28 }
 0x4a9   :  { %v4616_v12 = vpop.eup %4615  ;;  %v998_v46 = vpop.xlane.xlu1 %997  ;;  %4266 = vmatprep.subr.mxu1 %v4719_v28 }
 0x4aa   :  { %v1009_v35 = vmul.f32 %v4616_v12, %v4600_v7  ;;  %4623 = vrcp.f32 %v998_v46  ;;  %v1472_v56 = vpop.permute.xlu0 %1471  ;;  %v1756_v12 = vsub.s32 3, %v4854_v39 }
 0x4ac   :  { %v4618_v48 = vpop.eup %4617  ;;  %4244 = vmatmul.mubr.msk.f32.vlgmr.msra.gmra.mrb[10].mxu0 %vm318_vm5, %v1009_v35  ;;  %v1757_v46 = vrot.slane %v4862_v47, %v1756_v12 }
 0x4ad   :  { %v4620_v49 = vpop.eup %4619  ;;  %v1012_v51 = vmul.f32 %v4618_v48, %v4602_v16  ;;  %4252 = vmatpush3.msra.mxu0 %v1320_v33  ;;  %v1548_v52 = vpop.permute.xlu1 %1547  ;;  %4253 = vmatprep.mubr.msk.f32.mxu0 %vm4723_vm6, %v4719_v28 }
 0x4ae   :  { %v1011_v54 = vmul.f32 %v4620_v49, %v4604_v17  ;;  %4261 = vmatprep.subr.mxu0 %v4719_v28 }
 0x4af   :  { %4259 = vmatmul.mubr.msk.f32.vlgmr.msra.gmra.mrb[16].mxu1 %vm318_vm5, %v1012_v51 }
 0x4b0   :  { %4254 = vmatmul.mubr.msk.f32.vlgmr.msra.gmra.mrb[12].mxu0 %vm318_vm5, %v1011_v54  ;;  %4267 = vmatpush3.msra.mxu1 %v1548_v52 }
 0x4b1   :  { %v4622_v57 = vpop.eup %4621  ;;  %4262 = vmatpush3.msra.mxu0 %v1472_v56  ;;  %4263 = vmatprep.mubr.msk.f32.mxu0 %vm4723_vm6, %v4719_v28  ;;  %v4552_v9 = vpop.permute.xlu1 %4551 }
 0x4b2   :  { %v1013_v58 = vmul.f32 %v4622_v57, %v5042_v21  ;;  %4268 = vmatprep.mubr.msk.f32.mxu1 %vm4723_vm6, %v4719_v28  ;;  %v4554_v53 = vunpack.i.h.bf16 %v4552_v9  ;;  %v4553_v7 = vunpack.i.l.bf16 %v4552_v9 }
 0x4b4   :  { %v4624_v24 = vpop.eup %4623  ;;  %4264 = vmatmul.mubr.msk.f32.vlgmr.msra.gmra.mrb[14].mxu0 %vm318_vm5, %v1013_v58  ;;  %v4464_v17 = vpack.c.bf16 %v4554_v53, %v4553_v7  ;;  %v136_v53 = vld [vmem:[%s5560_s5 + $0x8] sm:$0xff]  ;;  %v137_v7 = vld [vmem:[%s5560_s5 + $0x10] sm:$0xff] }
 0x4b5   :  { %v1014_v26 = vmul.f32 %v4624_v24, %v5046_v29 }
 0x4b7   :  { %4269 = vmatmul.mubr.msk.f32.vlgmr.msra.gmra.mrb[18].mxu1 %vm318_vm5, %v1014_v26 }
 0x519   :  { %v4547_v8 = vpop.permute.xlu0 %4546 }
 0x51a   :  { %v4549_v14 = vunpack.i.h.bf16 %v4547_v8  ;;  %v4548_v16 = vunpack.i.l.bf16 %v4547_v8 }
 0x51c   :  { %v4460_v18 = vpack.c.bf16 %v4549_v14, %v4548_v16  ;;  %v138_v14 = vld [vmem:[%s5560_s5 + $0x18] sm:$0xff] }
 0x51d   :  { %v4480_v16 = vpack.c.bf16 %v138_v14, %v137_v7 }
 0x51e   :  { %4461 = vmatprep.subr.bf16.mxu0 %v4460_v18 }
 0x51f   :  { %4463 = vmatpush3.bf16.msra.mxu0 %v4460_v18 }
 0x520   :  { %4465 = vmatprep.subr.bf16.mxu0 %v4464_v17 }
 0x522   :  { %v1087_v61 = vpop.f32.mrb[8].mxu0 }
 0x523   :  { %v4235_v5 = vpop.f32.mrb[9].mxu0  ;;  %4467 = vmatpush3.bf16.msra.mxu0 %v4464_v17  ;;  %v140_v17 = vld [vmem:[%s5560_s5 + $0x28] sm:$0xff] }
 0x52d   :  { %v1163_v44 = vpop.f32.mrb[12].mxu1 }
 0x52e   :  { %v4240_v6 = vpop.f32.mrb[13].mxu1 }
 0x57a   :  { %v1315_v22 = vpop.f32.mrb[14].mxu1 }
 0x57b   :  { %1627 = vrot.lane.b32.xlu1 %v1315_v22, %s4725_s30  ;;  %v4250_v23 = vpop.f32.mrb[15].mxu1 }
 0x57f   :  { %v1239_v19 = vpop.f32.mrb[10].mxu0 }
 0x580   :  { %1625 = vrot.lane.b32.xlu0 %v1239_v19, %s4725_s30  ;;  %v4245_v21 = vpop.f32.mrb[11].mxu0 }
 0x582   :  { %v1467_v25 = vpop.f32.mrb[16].mxu1 }
 0x583   :  { %v1391_v29 = vpop.f32.mrb[12].mxu0  ;;  %1635 = vrot.lane.b32.xlu1 %v1467_v25, %s4726_s10  ;;  %v4260_v30 = vpop.f32.mrb[17].mxu1 }
 0x584   :  { %1633 = vrot.lane.b32.xlu0 %v1391_v29, %s4726_s10  ;;  %v4255_v31 = vpop.f32.mrb[13].mxu0 }
 0x587   :  { %v1543_v33 = vpop.f32.mrb[14].mxu0 }
 0x588   :  { %1641 = vrot.lane.b32.xlu0 %v1543_v33, %s4727_s11  ;;  %v4265_v34 = vpop.f32.mrb[15].mxu0 }
 0x58a   :  { %v1619_v37 = vpop.f32.mrb[18].mxu1 }
 0x58b   :  { %1643 = vrot.lane.b32.xlu1 %v1619_v37, %s4727_s11  ;;  %v4270_v38 = vpop.f32.mrb[19].mxu1 }
 0x5ed   :  { %v1628_v41 = vpop.permute.xlu1 %1627 }
 0x5ee   :  { %v1648_v11 = vsel %vm318_vm5, %v1163_v44, %v1628_v41 }
 0x5f2   :  { %v1626_v40 = vpop.permute.xlu0 %1625 }
 0x5f3   :  { %v1647_v15 = vsel %vm318_vm5, %v1087_v61, %v1626_v40 }
 0x5f5   :  { %v1636_v20 = vpop.permute.xlu1 %1635 }
 0x5f6   :  { %v1634_v63 = vpop.permute.xlu0 %1633  ;;  %v1651_v13 = vsel %vm1649_vm7, %v1648_v11, %v1636_v20 }
 0x5f7   :  { %v1650_v42 = vsel %vm1649_vm7, %v1647_v15, %v1634_v63 }
 0x5fa   :  { %v1642_v3 = vpop.permute.xlu0 %1641 }
 0x5fb   :  { %v1653_v10 = vsel %vm1652_vm8, %v1650_v42, %v1642_v3 }
 0x5fc   :  { %4279 = vmatprep.mubr.msk.f32.mxu0 %vm49_vm0, %v1653_v10 }
 0x5fd   :  { %v1644_v36 = vpop.permute.xlu1 %1643 }
 0x5fe   :  { %v1654_v43 = vsel %vm1652_vm8, %v1651_v13, %v1644_v36  ;;  %v1796_v36 = vsub.s32 4, %v4854_v39 }
 0x5ff   :  { %4280 = vmatmul.mubr.msk.f32.vlgmr.msra.gmra.mrb[16].mxu0 %vm49_vm0, %v1654_v43 }
 0x6d2   :  { %v4281_v35 = vpop.f32.mrb[16].mxu0 }
 0x6d3   :  { %v1753_v48 = vadd.f32 %v4281_v35, %v4790_v1  ;;  %v1743_v49 = vpop.f32.mrb[17].mxu0  ;;  %v1797_v35 = vrot.slane %v4862_v47, %v1796_v36 }
 0x6d4   :  { %v1752_v51 = vadd.f32 %v1743_v49, %v4785_v0 }
 0x6d5   :  { %v5114_v52 = vadd.f32 %v1757_v46, %v1753_v48  ;;  %v1808_v48 = vsub.s32 5, %v4854_v39 }
 0x6d6   :  { %v5116_v54 = vadd.f32 %v1757_v46, %v1752_v51 }
 0x6d7   :  { %v1763_v56 = vsel %vm49_vm0, %v5114_v52, 0.0  ;;  %v1809_v51 = vrot.slane %v4862_v47, %v1808_v48 }
 0x6d8   :  { %1764 = vadd.xlane.f32.xlu1 %v1763_v56  ;;  %v1760_v57 = vsel %vm49_vm0, %v5116_v54, 0.0 }
 0x6d9   :  { %1761 = vadd.xlane.f32.xlu0 %v1760_v57 }
 0x6e9   :  { %4561 = vrot.lane.b32.xlu1 %v5074_v55, %s4728_s12  ;;  %v135_v55 = vld [vmem:[%s5560_s5] sm:$0xff] }
 0x6ea   :  { %v4476_v8 = vpack.c.bf16 %v136_v53, %v135_v55 }
 0x6ec   :  { %4477 = vmatprep.subr.bf16.mxu0 %v4476_v8 }
 0x6ed   :  { %4479 = vmatpush3.bf16.msra.mxu0 %v4476_v8 }
 0x6ee   :  { %4481 = vmatprep.subr.bf16.mxu0 %v4480_v16 }
 0x6f1   :  { %4483 = vmatpush3.bf16.msra.mxu0 %v4480_v16  ;;  %v1997_v16 = vsub.s32 6, %v4854_v39 }
 0x765   :  { %v1765_v1 = vpop.xlane.xlu1 %1764 }
 0x766   :  { %v1767_v58 = vmul.f32 0.03125, %v1765_v1  ;;  %v1762_v24 = vpop.xlane.xlu0 %1761 }
 0x767   :  { %v1766_v0 = vmul.f32 0.03125, %v1762_v24 }
 0x768   :  { %v5125_v26 = vsub.f32 %v5114_v52, %v1767_v58 }
 0x769   :  { %v1768_v61 = vsub.f32 %v5116_v54, %v1766_v0  ;;  %v4562_v21 = vpop.permute.xlu1 %4561 }
 0x76a   :  { %v1771_v6 = vmul.f32 %v5125_v26, %v5125_v26  ;;  %v4564_v29 = vunpack.i.h.bf16 %v4562_v21  ;;  %v4563_v30 = vunpack.i.l.bf16 %v4562_v21  ;;  %v1799_v1 = vmul.f32 %v1797_v35, %v5125_v26 }
 0x76b   :  { %v1770_v5 = vmul.f32 %v1768_v61, %v1768_v61  ;;  %v1798_v49 = vmul.f32 %v1797_v35, %v1768_v61  ;;  %v141_v61 = vld [vmem:[%s5560_s5 + $0x30] sm:$0xff]  ;;  %v1815_v26 = vrot.slane %v4878_v60, %v4867_v50  ;;  %v1998_v60 = vrot.slane %v4862_v47, %v1997_v16 }
 0x76c   :  { %v1775_v9 = vsel %vm49_vm0, %v1771_v6, 0.0  ;;  %v4472_v38 = vpack.c.bf16 %v4564_v29, %v4563_v30 }
 0x76d   :  { %v1772_v44 = vsel %vm49_vm0, %v1770_v5, 0.0 }
 0x76e   :  { %1773 = vadd.xlane.f32.xlu0 %v1772_v44  ;;  %v142_v44 = vld [vmem:[%s5560_s5 + $0x38] sm:$0xff] }
 0x76f   :  { %v4488_v6 = vpack.c.bf16 %v142_v44, %v141_v61 }
 0x772   :  { %1776 = vadd.xlane.f32.xlu0 %v1775_v9 }
 0x788   :  { %4556 = vrot.lane.b32.xlu0 %v5090_v59, %s4728_s12  ;;  %v139_v59 = vld [vmem:[%s5560_s5 + $0x20] sm:$0xff] }
 0x789   :  { %v4484_v18 = vpack.c.bf16 %v140_v17, %v139_v59 }
 0x78b   :  { %4485 = vmatprep.subr.bf16.mxu0 %v4484_v18 }
 0x78c   :  { %4487 = vmatpush3.bf16.msra.mxu0 %v4484_v18 }
 0x78d   :  { %4489 = vmatprep.subr.bf16.mxu0 %v4488_v6 }
 0x790   :  { %4491 = vmatpush3.bf16.msra.mxu0 %v4488_v6 }
 0x791   :  { %4333 = vmatprep.subr.mxu0 %v4719_v28 }
 0x7fb   :  { %v1774_v22 = vpop.xlane.xlu0 %1773 }
 0x7fc   :  { %v1778_v23 = vmul.f32 0.032258064, %v1774_v22 }
 0x7fe   :  { %4625 = vrsqrt.f32 %v1778_v23  ;;  %vm1782_vm9 = vcmp.eq.f32.partialorder %v1778_v23, inf  ;;  %v1785_v63 = vand.u32 2147483648, %v1778_v23  ;;  %vm1784_vm10 = vcmp.eq.f32.partialorder %v1778_v23, 0.0 }
 0x7ff   :  { %v1777_v19 = vpop.xlane.xlu0 %1776 }
 0x800   :  { %v1779_v25 = vmul.f32 0.032258064, %v1777_v19 }
 0x802   :  { %4627 = vrsqrt.f32 %v1779_v25  ;;  %vm1789_vm11 = vcmp.eq.f32.partialorder %v1779_v25, inf  ;;  %v1792_v11 = vand.u32 2147483648, %v1779_v25  ;;  %vm1791_vm12 = vcmp.eq.f32.partialorder %v1779_v25, 0.0 }
 0x803   :  { %v4557_v31 = vpop.permute.xlu0 %4556 }
 0x804   :  { %v4559_v33 = vunpack.i.h.bf16 %v4557_v31  ;;  %v4558_v34 = vunpack.i.l.bf16 %v4557_v31 }
 0x806   :  { %v4468_v37 = vpack.c.bf16 %v4559_v33, %v4558_v34 }
 0x808   :  { %v4626_v40 = vpop.eup %4625  ;;  %4469 = vmatprep.subr.bf16.mxu1 %v4468_v37 }
 0x809   :  { %v1781_v41 = vmul.f32 %v4626_v40, %v1778_v23  ;;  %4471 = vmatpush3.bf16.msra.mxu1 %v4468_v37  ;;  %v5197_v40 = vld [vmem:[%s5562_s7 + $0x2] sm:$0x3] }
 0x80a   :  { %4473 = vmatprep.subr.bf16.mxu1 %v4472_v38 }
 0x80b   :  { %v1783_v15 = vsel %vm1782_vm9, %v1778_v23, %v1781_v41  ;;  %v2159_v41 = vrot.slane %v5197_v40, %v4857_v45 }
 0x80c   :  { %v4628_v20 = vpop.eup %4627  ;;  %v1786_v42 = vsel %vm1784_vm10, %v1785_v63, %v1783_v15  ;;  %v5205_v63 = vld [vmem:[%s5559_s4 + $0x20] sm:$0xff]  ;;  %v5210_v15 = vld [vmem:[%s5559_s4 + $0x28] sm:$0xff] }
 0x80d   :  { %v1788_v3 = vmul.f32 %v4628_v20, %v1779_v25  ;;  %4475 = vmatpush3.bf16.msra.mxu1 %v4472_v38  ;;  %v1800_v10 = vadd.f32 1e-06, %v1786_v42  ;;  %v5215_v20 = vld [vmem:[%s5559_s4 + $0x30] sm:$0xff]  ;;  %v4492_v42 = vpack.c.bf16 %v5210_v15, %v5205_v63 }
 0x80f   :  { %v1790_v13 = vsel %vm1789_vm11, %v1779_v25, %v1788_v3  ;;  %4629 = vrcp.f32 %v1800_v10  ;;  %v5222_v3 = vld [vmem:[%s5559_s4 + $0x38] sm:$0xff]  ;;  %4493 = vmatprep.subr.bf16.mxu1 %v4492_v42 }
 0x810   :  { %v1793_v43 = vsel %vm1791_vm12, %v1792_v11, %v1790_v13  ;;  %v4496_v10 = vpack.c.bf16 %v5222_v3, %v5215_v20 }
 0x811   :  { %v1801_v46 = vadd.f32 1e-06, %v1793_v43 }
 0x813   :  { %4631 = vrcp.f32 %v1801_v46 }
 0x819   :  { %v4630_v56 = vpop.eup %4629 }
 0x81a   :  { %v1803_v57 = vmul.f32 %v4630_v56, %v1798_v49 }
 0x81c   :  { %v1810_v58 = vadd.f32 %v1809_v51, %v1803_v57 }
 0x81d   :  { %v4632_v24 = vpop.eup %4631 }
 0x81e   :  { %v1805_v0 = vmul.f32 %v4632_v24, %v1799_v1  ;;  %4290 = vmatprep.mubr.msk.f32.mxu1 %vm49_vm0, %v1810_v58 }
 0x820   :  { %v1811_v5 = vadd.f32 %v1809_v51, %v1805_v0 }
 0x822   :  { %4291 = vmatmul.mubr.msk.f32.vlgmr.msra.gmra.mrb[20].mxu1 %vm49_vm0, %v1811_v5 }
 0x823   :  { %4495 = vmatpush3.bf16.msra.mxu1 %v4492_v42 }
 0x824   :  { %4497 = vmatprep.subr.bf16.mxu1 %v4496_v10 }
 0x827   :  { %4499 = vmatpush3.bf16.msra.mxu1 %v4496_v10 }
 0x828   :  { %4323 = vmatprep.subr.mxu1 %v4719_v28 }
 0x8f5   :  { %v4292_v9 = vpop.f32.mrb[20].mxu1 }
 0x8f6   :  { %v1906_v55 = vadd.f32 %v4292_v9, %v1815_v26  ;;  %v1900_v53 = vpop.f32.mrb[21].mxu1 }
 0x8f7   :  { %v1901_v7 = vadd.f32 %v1900_v53, %v1815_v26  ;;  %v5250_v26 = vld [vmem:[%s5561_s6 + $0x8] sm:$0x7f] }
 0x8f8   :  { %v1910_v14 = vmax.f32 %v1906_v55, 0.0  ;;  %v2056_v9 = vrot.slane %v5250_v26, %v4857_v45 }
 0x8f9   :  { %v1909_v8 = vmax.f32 %v1901_v7, 0.0 }
 0x8fb   :  { %4309 = vmatprep.mubr.msk.f32.mxu0 %vm1911_vm13, %v1909_v8  ;;  %v2068_v8 = vrot.slane %v5250_v26, %v4867_v50 }
 0x8fc   :  { %4310 = vmatmul.mubr.msk.f32.vlgmr.msra.gmra.mrb[18].mxu0 %vm1911_vm13, %v1910_v14 }
 0x8fd   :  { %4335 = vmatprep.mubr.msk.f32.mxu0 %vm4723_vm6, %v4719_v28 }
 0x9cf   :  { %v4311_v59 = vpop.f32.mrb[18].mxu0 }
 0x9d0   :  { %v1994_v17 = vadd.f32 %v4311_v59, %v5114_v52  ;;  %v1984_v18 = vpop.f32.mrb[19].mxu0 }
 0x9d1   :  { %v1993_v22 = vadd.f32 %v1984_v18, %v5116_v54 }
 0x9d2   :  { %v5182_v23 = vadd.f32 %v1998_v60, %v1994_v17 }
 0x9d3   :  { %v5184_v19 = vadd.f32 %v1998_v60, %v1993_v22 }
 0x9d4   :  { %v2022_v21 = vsel %vm49_vm0, %v5182_v23, 0.0 }
 0x9d5   :  { %2023 = vadd.xlane.f32.xlu0 %v2022_v21  ;;  %v2019_v25 = vsel %vm49_vm0, %v5184_v19, 0.0 }
 0x9d6   :  { %2020 = vadd.xlane.f32.xlu1 %v2019_v25 }
 0xa62   :  { %v2024_v29 = vpop.xlane.xlu0 %2023 }
 0xa63   :  { %v2026_v47 = vmul.f32 0.03125, %v2024_v29  ;;  %v2021_v30 = vpop.xlane.xlu1 %2020 }
 0xa64   :  { %v2025_v31 = vmul.f32 0.03125, %v2021_v30 }
 0xa65   :  { %v2028_v52 = vsub.f32 %v5182_v23, %v2026_v47 }
 0xa66   :  { %v2027_v54 = vsub.f32 %v5184_v19, %v2025_v31 }
 0xa67   :  { %v2030_v33 = vmul.f32 %v2028_v52, %v2028_v52  ;;  %v2058_v55 = vmul.f32 %v2056_v9, %v2028_v52  ;;  %v2074_v52 = vrot.slane %v5250_v26, %v201_v4 }
 0xa68   :  { %v2029_v34 = vmul.f32 %v2027_v54, %v2027_v54  ;;  %v2057_v7 = vmul.f32 %v2056_v9, %v2027_v54 }
 0xa69   :  { %v2034_v37 = vsel %vm49_vm0, %v2030_v33, 0.0 }
 0xa6a   :  { %2035 = vadd.xlane.f32.xlu1 %v2034_v37  ;;  %v2031_v38 = vsel %vm49_vm0, %v2029_v34, 0.0 }
 0xa6b   :  { %2032 = vadd.xlane.f32.xlu0 %v2031_v38 }
 0xa81   :  { %2161 = vrot.lane.b32.xlu0 %v2159_v41, %s4728_s12 }
 0xaf7   :  { %v2036_v11 = vpop.xlane.xlu1 %2035 }
 0xaf8   :  { %v2038_v13 = vmul.f32 0.032258064, %v2036_v11  ;;  %v2033_v43 = vpop.xlane.xlu0 %2032 }
 0xaf9   :  { %v2037_v46 = vmul.f32 0.032258064, %v2033_v43 }
 0xafa   :  { %4633 = vrsqrt.f32 %v2038_v13  ;;  %vm2048_vm14 = vcmp.eq.f32.partialorder %v2038_v13, inf  ;;  %vm2050_vm15 = vcmp.eq.f32.partialorder %v2038_v13, 0.0 }
 0xafb   :  { %4635 = vrsqrt.f32 %v2037_v46  ;;  %vm2041_vm1 = vcmp.eq.f32.partialorder %v2037_v46, inf  ;;  %v2044_v24 = vand.u32 2147483648, %v2037_v46  ;;  %vm2043_vm2 = vcmp.eq.f32.partialorder %v2037_v46, 0.0 }
 0xafc   :  { %v2162_v35 = vpop.permute.xlu0 %2161 }
 0xafd   :  { %v5228_v49 = vadd.f32 %v2162_v35, %v4887_v2  ;;  %v5231_v51 = vadd.f32 %v4882_v62, %v2162_v35  ;;  %v2051_v2 = vand.u32 2147483648, %v2038_v13 }
 0xaff   :  { %2188 = vrot.lane.b32.xlu0 %v5231_v51, %s4721_s13  ;;  %2182 = vrot.lane.b32.xlu1 %v5228_v49, %s4720_s0 }
 0xb03   :  { %2192 = vrot.lane.b32.xlu0 %v5231_v51, %s4722_s14  ;;  %2184 = vrot.lane.b32.xlu1 %v5231_v51, %s4720_s0 }
 0xb04   :  { %v4634_v56 = vpop.eup %4633 }
 0xb05   :  { %v4636_v57 = vpop.eup %4635  ;;  %v2047_v1 = vmul.f32 %v4634_v56, %v2038_v13 }
 0xb06   :  { %v2040_v58 = vmul.f32 %v4636_v57, %v2037_v46 }
 0xb07   :  { %v2049_v62 = vsel %vm2048_vm14, %v2038_v13, %v2047_v1  ;;  %2270 = vrot.lane.b32.xlu0 %v5231_v51, %s4728_s12  ;;  %2186 = vrot.lane.b32.xlu1 %v5228_v49, %s4721_s13 }
 0xb08   :  { %v2052_v0 = vsel %vm2050_vm15, %v2051_v2, %v2049_v62  ;;  %v2042_v5 = vsel %vm2041_vm1, %v2037_v46, %v2040_v58 }
 0xb09   :  { %v2060_v61 = vadd.f32 1e-06, %v2052_v0  ;;  %v2045_v44 = vsel %vm2043_vm2, %v2044_v24, %v2042_v5 }
 0xb0a   :  { %v2059_v6 = vadd.f32 1e-06, %v2045_v44  ;;  %v4689_v44 = vld [vmem:[%s5557_s2 + $0x8] sm:$0xff] }
 0xb0b   :  { %4637 = vrcp.f32 %v2060_v61  ;;  %2190 = vrot.lane.b32.xlu1 %v5228_v49, %s4722_s14 }
 0xb0c   :  { %4639 = vrcp.f32 %v2059_v6 }
 0xb0f   :  { %2194 = vrot.lane.b32.xlu1 %v5228_v49, %s4728_s12 }
 0xb15   :  { %v4638_v53 = vpop.eup %4637 }
 0xb16   :  { %v4640_v14 = vpop.eup %4639  ;;  %v2064_v60 = vmul.f32 %v4638_v53, %v2058_v55 }
 0xb17   :  { %v2062_v59 = vmul.f32 %v4640_v14, %v2057_v7 }
 0xb18   :  { %v2070_v18 = vadd.f32 %v2068_v8, %v2064_v60 }
 0xb19   :  { %v2069_v17 = vadd.f32 %v2068_v8, %v2062_v59  ;;  %v4690_v59 = vld [vmem:[%s5557_s2 + $0x10] sm:$0xff] }
 0xb1b   :  { %4320 = vmatprep.mubr.msk.f32.mxu1 %vm49_vm0, %v2069_v17 }
 0xb1c   :  { %4321 = vmatmul.mubr.msk.f32.vlgmr.msra.gmra.mrb[22].mxu1 %vm49_vm0, %v2070_v18 }
 0xb1d   :  { %4325 = vmatprep.mubr.msk.f32.mxu1 %vm4723_vm6, %v4719_v28 }
 0xb71   :  { %v5262_v22 = vpop.permute.xlu1 %2182  ;;  %v5270_v21 = vpop.permute.xlu0 %2188 }
 0xb72   :  { %2346 = vrot.lane.b32.xlu1 %v5262_v22, %s4728_s12 }
 0xb75   :  { %v5266_v45 = vpop.permute.xlu1 %2184  ;;  %v5278_v29 = vpop.permute.xlu0 %2192 }
 0xb76   :  { %2422 = vrot.lane.b32.xlu0 %v5266_v45, %s4728_s12 }
 0xb79   :  { %v5272_v25 = vpop.permute.xlu1 %2186  ;;  %v2271_v38 = vpop.permute.xlu0 %2270 }
 0xb7a   :  { %2574 = vrot.lane.b32.xlu0 %v5270_v21, %s4728_s12  ;;  %2498 = vrot.lane.b32.xlu1 %v5272_v25, %s4728_s12 }
 0xb7d   :  { %v5280_v47 = vpop.permute.xlu1 %2190 }
 0xb7e   :  { %2726 = vrot.lane.b32.xlu0 %v5278_v29, %s4728_s12  ;;  %2650 = vrot.lane.b32.xlu1 %v5280_v47, %s4728_s12 }
 0xb81   :  { %v2195_v30 = vpop.permute.xlu1 %2194 }
 0xb82   :  { %4324 = vmatpush3.xpose.msk.msra.mxu1 %vm318_vm5, %v2195_v30 }
 0xb83   :  { %4328 = vmatprep.subr.mxu1 %v4719_v28 }
 0xbe4   :  { %v2347_v31 = vpop.permute.xlu1 %2346 }
 0xbe5   :  { %4334 = vmatpush3.xpose.msk.msra.mxu0 %vm318_vm5, %v2347_v31  ;;  %v4691_v31 = vld [vmem:[%s5557_s2 + $0x18] sm:$0xff] }
 0xbe6   :  { %4343 = vmatprep.subr.mxu0 %v4719_v28 }
 0xbe8   :  { %v2423_v4 = vpop.permute.xlu0 %2422 }
 0xbec   :  { %v2575_v41 = vpop.permute.xlu0 %2574  ;;  %v2499_v42 = vpop.permute.xlu1 %2498 }
 0xbef   :  { %v4322_v54 = vpop.f32.mrb[22].mxu1 }
 0xbf0   :  { %v2153_v33 = vadd.f32 %v4322_v54, %v2074_v52  ;;  %v2147_v34 = vpop.f32.mrb[23].mxu1  ;;  %v2727_v10 = vpop.permute.xlu0 %2726 }
 0xbf1   :  { %v2148_v37 = vadd.f32 %v2147_v34, %v2074_v52  ;;  %v2651_v11 = vpop.permute.xlu1 %2650 }
 0xbf2   :  { %2170 = vrot.lane.b32.xlu0 %v2153_v33, %s4720_s0 }
 0xbf3   :  { %2168 = vrot.lane.b32.xlu1 %v2148_v37, %s4720_s0  ;;  %4326 = vmatmul.mubr.msk.f32.vlgmr.msra.gmra.mrb[24].mxu1 %vm318_vm5, %v2148_v37 }
 0xbf4   :  { %4329 = vmatpush3.xpose.msk.msra.mxu1 %vm318_vm5, %v2271_v38  ;;  %4330 = vmatprep.mubr.msk.f32.mxu1 %vm4723_vm6, %v4719_v28 }
 0xbf5   :  { %4338 = vmatprep.subr.mxu1 %v4719_v28 }
 0xbf6   :  { %2174 = vrot.lane.b32.xlu0 %v2153_v33, %s4721_s13 }
 0xbf7   :  { %2172 = vrot.lane.b32.xlu1 %v2148_v37, %s4721_s13  ;;  %4331 = vmatmul.mubr.msk.f32.vlgmr.msra.gmra.mrb[26].mxu1 %vm318_vm5, %v2153_v33 }
 0xbf8   :  { %4339 = vmatpush3.xpose.msk.msra.mxu1 %vm318_vm5, %v2423_v4  ;;  %4340 = vmatprep.mubr.msk.f32.mxu1 %vm4723_vm6, %v4719_v28  ;;  %v4692_v4 = vld [vmem:[%s5557_s2 + $0x20] sm:$0xff] }
 0xbf9   :  { %4348 = vmatprep.subr.mxu1 %v4719_v28 }
 0xbfa   :  { %2178 = vrot.lane.b32.xlu0 %v2153_v33, %s4722_s14 }
 0xbfb   :  { %2176 = vrot.lane.b32.xlu1 %v2148_v37, %s4722_s14 }
 0xc64   :  { %v2171_v13 = vpop.permute.xlu0 %2170 }
 0xc65   :  { %4341 = vmatmul.mubr.msk.f32.vlgmr.msra.gmra.mrb[28].mxu1 %vm318_vm5, %v2171_v13  ;;  %v2169_v43 = vpop.permute.xlu1 %2168 }
 0xc66   :  { %4349 = vmatpush3.xpose.msk.msra.mxu1 %vm318_vm5, %v2575_v41  ;;  %4336 = vmatmul.mubr.msk.f32.vlgmr.msra.gmra.mrb[20].mxu0 %vm318_vm5, %v2169_v43 }
 0xc67   :  { %4344 = vmatpush3.xpose.msk.msra.mxu0 %vm318_vm5, %v2499_v42  ;;  %4350 = vmatprep.mubr.msk.f32.mxu1 %vm4723_vm6, %v4719_v28 }
 0xc68   :  { %v2175_v46 = vpop.permute.xlu0 %2174  ;;  %4358 = vmatprep.subr.mxu1 %v4719_v28  ;;  %4345 = vmatprep.mubr.msk.f32.mxu0 %vm4723_vm6, %v4719_v28 }
 0xc69   :  { %4351 = vmatmul.mubr.msk.f32.vlgmr.msra.gmra.mrb[30].mxu1 %vm318_vm5, %v2175_v46  ;;  %4353 = vmatprep.subr.mxu0 %v4719_v28  ;;  %v2173_v35 = vpop.permute.xlu1 %2172 }
 0xc6a   :  { %4359 = vmatpush3.xpose.msk.msra.mxu1 %vm318_vm5, %v2727_v10  ;;  %4346 = vmatmul.mubr.msk.f32.vlgmr.msra.gmra.mrb[22].mxu0 %vm318_vm5, %v2173_v35 }
 0xc6b   :  { %4354 = vmatpush3.xpose.msk.msra.mxu0 %vm318_vm5, %v2651_v11  ;;  %4360 = vmatprep.mubr.msk.f32.mxu1 %vm4723_vm6, %v4719_v28 }
 0xc6c   :  { %v2179_v56 = vpop.permute.xlu0 %2178  ;;  %4355 = vmatprep.mubr.msk.f32.mxu0 %vm4723_vm6, %v4719_v28  ;;  %4363 = vmatprep.subr.mxu0 %v4719_v28 }
 0xc6d   :  { %4361 = vmatmul.mubr.msk.f32.vlgmr.msra.gmra.mrb[32].mxu1 %vm318_vm5, %v2179_v56  ;;  %v2177_v57 = vpop.permute.xlu1 %2176  ;;  %4368 = vmatprep.subr.mxu1 %v4719_v28  ;;  %v4693_v56 = vld [vmem:[%s5557_s2 + $0x28] sm:$0xff] }
 0xc6e   :  { %4356 = vmatmul.mubr.msk.f32.vlgmr.msra.gmra.mrb[24].mxu0 %vm318_vm5, %v2177_v57  ;;  %4370 = vmatprep.mubr.msk.f32.mxu1 %vm4723_vm6, %v4719_v28 }
 0xc6f   :  { %4365 = vmatprep.mubr.msk.f32.mxu0 %vm4723_vm6, %v4719_v28 }
 0xcc6   :  { %v2266_v1 = vpop.f32.mrb[24].mxu1 }
 0xcc7   :  { %v2802_v2 = vmul.f32 0.35355338, %v2266_v1  ;;  %v4327_v58 = vpop.f32.mrb[25].mxu1  ;;  %v4694_v1 = vld [vmem:[%s5557_s2 + $0x30] sm:$0xff] }
 0xcc9   :  { %v5336_v62 = vadd.f32 %v2802_v2, %v4984_v32 }
 0xcca   :  { %v2342_v24 = vpop.f32.mrb[26].mxu1 }
 0xccb   :  { %v2803_v0 = vmul.f32 0.35355338, %v2342_v24  ;;  %v4332_v5 = vpop.f32.mrb[27].mxu1  ;;  %v2818_v61 = vsel %vm318_vm5, %v5336_v62, -inf }
 0xccc   :  { %2819 = vmax.xlane.f32.xlu1 %v2818_v61 }
 0xccd   :  { %v2811_v6 = vadd.f32 %v4689_v44, %v2803_v0 }
 0xccf   :  { %v2821_v9 = vsel %vm318_vm5, %v2811_v6, -inf }
 0xcd0   :  { %2822 = vmax.xlane.f32.xlu0 %v2821_v9 }
 0xd38   :  { %v2494_v55 = vpop.f32.mrb[28].mxu1 }
 0xd39   :  { %v2805_v53 = vmul.f32 0.35355338, %v2494_v55  ;;  %v2418_v7 = vpop.f32.mrb[20].mxu0  ;;  %v4342_v32 = vpop.f32.mrb[29].mxu1 }
 0xd3a   :  { %v2804_v8 = vmul.f32 0.35355338, %v2418_v7  ;;  %v4337_v14 = vpop.f32.mrb[21].mxu0 }
 0xd3b   :  { %v2813_v52 = vadd.f32 %v4691_v31, %v2805_v53 }
 0xd3c   :  { %v2646_v60 = vpop.f32.mrb[30].mxu1  ;;  %v2812_v17 = vadd.f32 %v4690_v59, %v2804_v8 }
 0xd3d   :  { %v2570_v18 = vpop.f32.mrb[22].mxu0  ;;  %v4352_v30 = vpop.f32.mrb[31].mxu1  ;;  %v2807_v54 = vmul.f32 0.35355338, %v2646_v60  ;;  %v2827_v11 = vsel %vm318_vm5, %v2813_v52, -inf }
 0xd3e   :  { %v2806_v33 = vmul.f32 0.35355338, %v2570_v18  ;;  %v4347_v34 = vpop.f32.mrb[23].mxu0  ;;  %v2824_v37 = vsel %vm318_vm5, %v2812_v17, -inf }
 0xd3f   :  { %2825 = vmax.xlane.f32.xlu0 %v2824_v37  ;;  %v2815_v57 = vadd.f32 %v4693_v56, %v2807_v54 }
 0xd40   :  { %v2798_v38 = vpop.f32.mrb[32].mxu1  ;;  %v2814_v41 = vadd.f32 %v4692_v4, %v2806_v33 }
 0xd41   :  { %v2722_v42 = vpop.f32.mrb[24].mxu0  ;;  %v4362_v10 = vpop.f32.mrb[33].mxu1  ;;  %v2809_v13 = vmul.f32 0.35355338, %v2798_v38  ;;  %v2833_v58 = vsel %vm318_vm5, %v2815_v57, -inf }
 0xd42   :  { %v2808_v43 = vmul.f32 0.35355338, %v2722_v42  ;;  %v4357_v46 = vpop.f32.mrb[25].mxu0  ;;  %v2830_v35 = vsel %vm318_vm5, %v2814_v41, -inf }
 0xd43   :  { %2828 = vmax.xlane.f32.xlu0 %v2827_v11  ;;  %2831 = vmax.xlane.f32.xlu1 %v2830_v35  ;;  %v2817_v0 = vadd.f32 %v2809_v13, %v5011_v27 }
 0xd44   :  { %v2816_v2 = vadd.f32 %v4694_v1, %v2808_v43 }
 0xd45   :  { %v2839_v5 = vsel %vm318_vm5, %v2817_v0, -inf }
 0xd46   :  { %v2836_v24 = vsel %vm318_vm5, %v2816_v2, -inf }
 0xd47   :  { %2834 = vmax.xlane.f32.xlu0 %v2833_v58  ;;  %2837 = vmax.xlane.f32.xlu1 %v2836_v24 }
 0xd4b   :  { %2840 = vmax.xlane.f32.xlu0 %v2839_v5 }
 0xd58   :  { %2906 = vrot.lane.b32.xlu1 %v5228_v49, %s4729_s17 }
 0xd59   :  { %v2820_v44 = vpop.xlane.xlu1 %2819 }
 0xd5a   :  { %v2842_v49 = vsub.f32 %v5336_v62, %v2820_v44 }
 0xd5c   :  { %3058 = vrot.lane.b32.xlu1 %v5262_v22, %s4729_s17  ;;  %v2850_v55 = vmul.f32 1.442695, %v2842_v49 }
 0xd5d   :  { %v2823_v27 = vpop.xlane.xlu0 %2822 }
 0xd5e   :  { %v2843_v61 = vsub.f32 %v2811_v6, %v2823_v27 }
 0xd60   :  { %3134 = vrot.lane.b32.xlu1 %v5266_v45, %s4729_s17  ;;  %v2852_v9 = vmul.f32 1.442695, %v2843_v61 }
 0xd61   :  { %2982 = vrot.lane.b32.xlu0 %v5231_v51, %s4729_s17 }
 0xd62   :  { %4641 = vpow2.f32 %v2852_v9 }
 0xd63   :  { %4643 = vpow2.f32 %v2850_v55 }
 0xd64   :  { %3210 = vrot.lane.b32.xlu1 %v5272_v25, %s4729_s17 }
 0xd65   :  { %3286 = vrot.lane.b32.xlu0 %v5270_v21, %s4729_s17 }
 0xd6c   :  { %v5379_v22 = vpop.eup %4641 }
 0xd6d   :  { %v2869_v51 = vsel %vm318_vm5, %v5379_v22, 0.0  ;;  %v5383_v45 = vpop.eup %4643 }
 0xd6e   :  { %v2866_v21 = vsel %vm318_vm5, %v5383_v45, 0.0 }
 0xd84   :  { %2870 = vadd.xlane.f32.xlu0 %v2869_v51 }
 0xd88   :  { %2867 = vadd.xlane.f32.xlu1 %v2866_v21 }
 0xdcc   :  { %v2826_v25 = vpop.xlane.xlu0 %2825 }
 0xdcd   :  { %v2844_v6 = vsub.f32 %v2812_v17, %v2826_v25 }
 0xdcf   :  { %v2854_v53 = vmul.f32 1.442695, %v2844_v6  ;;  %v5420_v6 = vpack.i.bf16 %v5210_v15, %v5205_v63 }
 0xdd0   :  { %v2829_v62 = vpop.xlane.xlu0 %2828  ;;  %v2832_v7 = vpop.xlane.xlu1 %2831 }
 0xdd1   :  { %4645 = vpow2.f32 %v2854_v53  ;;  %v2845_v32 = vsub.f32 %v2813_v52, %v2829_v62  ;;  %v2846_v8 = vsub.f32 %v2814_v41, %v2832_v7  ;;  %v5424_v53 = vpack.i.bf16 %v5222_v3, %v5215_v20 }
 0xdd3   :  { %v2856_v14 = vmul.f32 1.442695, %v2845_v32  ;;  %v2858_v60 = vmul.f32 1.442695, %v2846_v8 }
 0xdd4   :  { %v2835_v59 = vpop.xlane.xlu0 %2834  ;;  %v2838_v18 = vpop.xlane.xlu1 %2837 }
 0xdd5   :  { %4647 = vpow2.f32 %v2856_v14  ;;  %v2847_v30 = vsub.f32 %v2815_v57, %v2835_v59  ;;  %v2848_v31 = vsub.f32 %v2816_v2, %v2838_v18 }
 0xdd6   :  { %4649 = vpow2.f32 %v2858_v60 }
 0xdd7   :  { %v2860_v54 = vmul.f32 1.442695, %v2847_v30  ;;  %v2862_v33 = vmul.f32 1.442695, %v2848_v31 }
 0xdd8   :  { %v2841_v34 = vpop.xlane.xlu0 %2840  ;;  %v2907_v37 = vpop.permute.xlu1 %2906 }
 0xdd9   :  { %4651 = vpow2.f32 %v2860_v54  ;;  %v2849_v17 = vsub.f32 %v2817_v0, %v2841_v34  ;;  %4364 = vmatpush3.msra.mxu0 %v2907_v37 }
 0xdda   :  { %4653 = vpow2.f32 %v2862_v33  ;;  %4373 = vmatprep.subr.mxu0 %v4719_v28 }
 0xddb   :  { %v4646_v52 = vpop.eup %4645  ;;  %v2864_v38 = vmul.f32 1.442695, %v2849_v17 }
 0xddc   :  { %v2983_v4 = vpop.permute.xlu0 %2982  ;;  %v2872_v41 = vsel %vm318_vm5, %v4646_v52, 0.0  ;;  %v3059_v2 = vpop.permute.xlu1 %3058 }
 0xddd   :  { %4655 = vpow2.f32 %v2864_v38  ;;  %4369 = vmatpush3.msra.mxu1 %v2983_v4  ;;  %2873 = vadd.xlane.f32.xlu1 %v2872_v41 }
 0xdde   :  { %4378 = vmatprep.subr.mxu1 %v4719_v28 }
 0xddf   :  { %v4648_v42 = vpop.eup %4647 }
 0xde0   :  { %v4650_v10 = vpop.eup %4649  ;;  %v2875_v11 = vsel %vm318_vm5, %v4648_v42, 0.0  ;;  %v3135_v58 = vpop.permute.xlu1 %3134 }
 0xde1   :  { %2876 = vadd.xlane.f32.xlu0 %v2875_v11  ;;  %v2878_v13 = vsel %vm318_vm5, %v4650_v10, 0.0  ;;  %v3287_v24 = vpop.permute.xlu0 %3286 }
 0xde2   :  { %2879 = vadd.xlane.f32.xlu1 %v2878_v13 }
 0xde3   :  { %v5392_v43 = vpop.eup %4651 }
 0xde4   :  { %v5394_v46 = vpop.eup %4653  ;;  %v2881_v35 = vsel %vm318_vm5, %v5392_v43, 0.0  ;;  %v3211_v0 = vpop.permute.xlu1 %3210 }
 0xde5   :  { %2882 = vadd.xlane.f32.xlu0 %v2881_v35  ;;  %v2884_v56 = vsel %vm318_vm5, %v5394_v46, 0.0 }
 0xde6   :  { %2885 = vadd.xlane.f32.xlu1 %v2884_v56 }
 0xde7   :  { %v5400_v57 = vpop.eup %4655 }
 0xde8   :  { %v2887_v1 = vsel %vm318_vm5, %v5400_v57, 0.0 }
 0xde9   :  { %2888 = vadd.xlane.f32.xlu0 %v2887_v1 }
 0xdf7   :  { %3362 = vrot.lane.b32.xlu1 %v5280_v47, %s4729_s17 }
 0xdfb   :  { %4566 = vrot.lane.b32.xlu1 %v5420_v6, %s4724_s29 }
 0xdff   :  { %3438 = vrot.lane.b32.xlu0 %v5278_v29, %s4729_s17 }
 0xe03   :  { %4571 = vrot.lane.b32.xlu0 %v5424_v53, %s4724_s29 }
 0xe11   :  { %v2871_v5 = vpop.xlane.xlu0 %2870 }
 0xe12   :  { %4657 = vrcp.f32 %v2871_v5 }
 0xe15   :  { %v2868_v27 = vpop.xlane.xlu1 %2867 }
 0xe16   :  { %4659 = vrcp.f32 %v2868_v27 }
 0xe1c   :  { %v4658_v61 = vpop.eup %4657 }
 0xe1d   :  { %v2899_v44 = vmul.f32 %v4658_v61, %v5379_v22 }
 0xe1f   :  { %4371 = vmatmul.mubr.msk.f32.vlgmr.msra.gmra.mrb[34].mxu1 %vm318_vm5, %v2899_v44 }
 0xe20   :  { %v4660_v49 = vpop.eup %4659  ;;  %4379 = vmatpush3.msra.mxu1 %v3135_v58  ;;  %4380 = vmatprep.mubr.msk.f32.mxu1 %vm4723_vm6, %v4719_v28 }
 0xe21   :  { %v2898_v29 = vmul.f32 %v4660_v49, %v5383_v45  ;;  %4388 = vmatprep.subr.mxu1 %v4719_v28 }
 0xe23   :  { %4366 = vmatmul.mubr.msk.f32.vlgmr.msra.gmra.mrb[26].mxu0 %vm318_vm5, %v2898_v29 }
 0xe24   :  { %4374 = vmatpush3.msra.mxu0 %v3059_v2  ;;  %4375 = vmatprep.mubr.msk.f32.mxu0 %vm4723_vm6, %v4719_v28 }
 0xe25   :  { %4383 = vmatprep.subr.mxu0 %v4719_v28 }
 0xe6a   :  { %v2874_v47 = vpop.xlane.xlu1 %2873 }
 0xe6b   :  { %4661 = vrcp.f32 %v2874_v47 }
 0xe6e   :  { %v2877_v9 = vpop.xlane.xlu0 %2876 }
 0xe6f   :  { %4663 = vrcp.f32 %v2877_v9  ;;  %v2880_v55 = vpop.xlane.xlu1 %2879 }
 0xe70   :  { %4665 = vrcp.f32 %v2880_v55 }
 0xe72   :  { %v2883_v22 = vpop.xlane.xlu0 %2882 }
 0xe73   :  { %4667 = vrcp.f32 %v2883_v22  ;;  %v2886_v51 = vpop.xlane.xlu1 %2885 }
 0xe74   :  { %4669 = vrcp.f32 %v2886_v51  ;;  %v3646_v51 = vrot.slane %v5250_v26, %v1756_v12 }
 0xe75   :  { %v4662_v45 = vpop.eup %4661 }
 0xe76   :  { %v2900_v21 = vmul.f32 %v4662_v45, %v4646_v52  ;;  %v2889_v25 = vpop.xlane.xlu0 %2888 }
 0xe77   :  { %4671 = vrcp.f32 %v2889_v25  ;;  %v3363_v20 = vpop.permute.xlu1 %3362 }
 0xe78   :  { %4376 = vmatmul.mubr.msk.f32.vlgmr.msra.gmra.mrb[28].mxu0 %vm318_vm5, %v2900_v21 }
 0xe79   :  { %v4664_v62 = vpop.eup %4663  ;;  %4384 = vmatpush3.msra.mxu0 %v3211_v0  ;;  %4385 = vmatprep.mubr.msk.f32.mxu0 %vm4723_vm6, %v4719_v28 }
 0xe7a   :  { %v4666_v7 = vpop.eup %4665  ;;  %v2901_v32 = vmul.f32 %v4664_v62, %v4648_v42  ;;  %4393 = vmatprep.subr.mxu0 %v4719_v28  ;;  %v3439_v60 = vpop.permute.xlu0 %3438 }
 0xe7b   :  { %v2902_v63 = vmul.f32 %v4666_v7, %v4650_v10  ;;  %v4567_v30 = vpop.permute.xlu1 %4566 }
 0xe7c   :  { %4381 = vmatmul.mubr.msk.f32.vlgmr.msra.gmra.mrb[36].mxu1 %vm318_vm5, %v2901_v32  ;;  %v4569_v31 = vunpack.i.h.bf16 %v4567_v30  ;;  %v4568_v54 = vunpack.i.l.bf16 %v4567_v30 }
 0xe7d   :  { %v4668_v15 = vpop.eup %4667  ;;  %4386 = vmatmul.mubr.msk.f32.vlgmr.msra.gmra.mrb[30].mxu0 %vm318_vm5, %v2902_v63  ;;  %4389 = vmatpush3.msra.mxu1 %v3287_v24 }
 0xe7e   :  { %v4670_v3 = vpop.eup %4669  ;;  %v2903_v8 = vmul.f32 %v4668_v15, %v5392_v43  ;;  %4394 = vmatpush3.msra.mxu0 %v3363_v20  ;;  %4390 = vmatprep.mubr.msk.f32.mxu1 %vm4723_vm6, %v4719_v28  ;;  %v4572_v33 = vpop.permute.xlu0 %4571  ;;  %v4500_v17 = vpack.c.bf16 %v4569_v31, %v4568_v54 }
 0xe7f   :  { %v2904_v14 = vmul.f32 %v4670_v3, %v5394_v46  ;;  %4395 = vmatprep.mubr.msk.f32.mxu0 %vm4723_vm6, %v4719_v28  ;;  %4398 = vmatprep.subr.mxu1 %v4719_v28  ;;  %v4574_v34 = vunpack.i.h.bf16 %v4572_v33  ;;  %v4573_v37 = vunpack.i.l.bf16 %v4572_v33  ;;  %v3999_v33 = vld [vmem:[%s5560_s5 + $0x40] sm:$0xff] }
 0xe80   :  { %4391 = vmatmul.mubr.msk.f32.vlgmr.msra.gmra.mrb[38].mxu1 %vm318_vm5, %v2903_v8  ;;  %4501 = vmatprep.subr.bf16.mxu0 %v4500_v17 }
 0xe81   :  { %v4672_v59 = vpop.eup %4671  ;;  %4396 = vmatmul.mubr.msk.f32.vlgmr.msra.gmra.mrb[32].mxu0 %vm318_vm5, %v2904_v14  ;;  %4399 = vmatpush3.msra.mxu1 %v3439_v60  ;;  %v4504_v52 = vpack.c.bf16 %v4574_v34, %v4573_v37  ;;  %v4000_v34 = vld [vmem:[%s5560_s5 + $0x48] sm:$0xff]  ;;  %v4001_v37 = vld [vmem:[%s5560_s5 + $0x50] sm:$0xff] }
 0xe82   :  { %v2905_v18 = vmul.f32 %v4672_v59, %v5400_v57  ;;  %4400 = vmatprep.mubr.msk.f32.mxu1 %vm4723_vm6, %v4719_v28  ;;  %4503 = vmatpush3.bf16.msra.mxu0 %v4500_v17  ;;  %v4516_v17 = vpack.c.bf16 %v4000_v34, %v3999_v33 }
 0xe83   :  { %4505 = vmatprep.subr.bf16.mxu0 %v4504_v52 }
 0xe84   :  { %4401 = vmatmul.mubr.msk.f32.vlgmr.msra.gmra.mrb[40].mxu1 %vm318_vm5, %v2905_v18 }
 0xe86   :  { %4507 = vmatpush3.bf16.msra.mxu0 %v4504_v52 }
 0xe87   :  { %4517 = vmatprep.subr.bf16.mxu0 %v4516_v17 }
 0xef2   :  { %v3054_v38 = vpop.f32.mrb[34].mxu1 }
 0xef3   :  { %v4372_v4 = vpop.f32.mrb[35].mxu1 }
 0xef4   :  { %v4004_v4 = vld [vmem:[%s5560_s5 + $0x68] sm:$0xff] }
 0xef6   :  { %v2978_v41 = vpop.f32.mrb[26].mxu0 }
 0xef7   :  { %v4367_v42 = vpop.f32.mrb[27].mxu0 }
 0xf4b   :  { %v3130_v10 = vpop.f32.mrb[28].mxu0 }
 0xf4c   :  { %3516 = vrot.lane.b32.xlu1 %v3130_v10, %s4725_s30  ;;  %v4377_v28 = vpop.f32.mrb[29].mxu0 }
 0xf4f   :  { %v3206_v11 = vpop.f32.mrb[36].mxu1 }
 0xf50   :  { %v3282_v13 = vpop.f32.mrb[30].mxu0  ;;  %3518 = vrot.lane.b32.xlu0 %v3206_v11, %s4725_s30  ;;  %v4382_v43 = vpop.f32.mrb[37].mxu1 }
 0xf51   :  { %3524 = vrot.lane.b32.xlu1 %v3282_v13, %s4726_s10  ;;  %v4387_v46 = vpop.f32.mrb[31].mxu0 }
 0xf53   :  { %v3358_v35 = vpop.f32.mrb[38].mxu1 }
 0xf54   :  { %v3434_v56 = vpop.f32.mrb[32].mxu0  ;;  %3526 = vrot.lane.b32.xlu0 %v3358_v35, %s4726_s10  ;;  %v4392_v57 = vpop.f32.mrb[39].mxu1 }
 0xf55   :  { %3532 = vrot.lane.b32.xlu1 %v3434_v56, %s4727_s11  ;;  %v4397_v1 = vpop.f32.mrb[33].mxu0 }
 0xf57   :  { %v3510_v2 = vpop.f32.mrb[40].mxu1 }
 0xf58   :  { %3534 = vrot.lane.b32.xlu0 %v3510_v2, %s4727_s11  ;;  %v4402_v58 = vpop.f32.mrb[41].mxu1 }
 0xfbe   :  { %v3517_v24 = vpop.permute.xlu1 %3516 }
 0xfbf   :  { %v3538_v27 = vsel %vm318_vm5, %v2978_v41, %v3517_v24 }
 0xfc2   :  { %v3519_v0 = vpop.permute.xlu0 %3518 }
 0xfc3   :  { %v3525_v5 = vpop.permute.xlu1 %3524  ;;  %v3539_v47 = vsel %vm318_vm5, %v3054_v38, %v3519_v0  ;;  %v4003_v38 = vld [vmem:[%s5560_s5 + $0x60] sm:$0xff] }
 0xfc4   :  { %v3540_v44 = vsel %vm1649_vm7, %v3538_v27, %v3525_v5  ;;  %v4524_v41 = vpack.c.bf16 %v4004_v4, %v4003_v38 }
 0xfc6   :  { %v3527_v61 = vpop.permute.xlu0 %3526 }
 0xfc7   :  { %v3533_v49 = vpop.permute.xlu1 %3532  ;;  %v3541_v9 = vsel %vm1649_vm7, %v3539_v47, %v3527_v61 }
 0xfc8   :  { %v3542_v29 = vsel %vm1652_vm8, %v3540_v44, %v3533_v49 }
 0xfc9   :  { %4411 = vmatprep.mubr.msk.f32.mxu0 %vm49_vm0, %v3542_v29  ;;  %v3686_v29 = vrot.slane %v5250_v26, %v1796_v36  ;;  %v4005_v36 = vld [vmem:[%s5560_s5 + $0x70] sm:$0xff] }
 0xfca   :  { %v3535_v55 = vpop.permute.xlu0 %3534 }
 0xfcb   :  { %v3543_v22 = vsel %vm1652_vm8, %v3541_v9, %v3535_v55  ;;  %v3698_v9 = vrot.slane %v5250_v26, %v1808_v48  ;;  %v4006_v48 = vld [vmem:[%s5560_s5 + $0x78] sm:$0xff] }
 0xfcc   :  { %4412 = vmatmul.mubr.msk.f32.vlgmr.msra.gmra.mrb[34].mxu0 %vm49_vm0, %v3543_v22 }
 0xfcd   :  { %4519 = vmatpush3.bf16.msra.mxu0 %v4516_v17 }
0x109f   :  { %v4413_v45 = vpop.f32.mrb[34].mxu0 }
0x10a0   :  { %v3642_v21 = vadd.f32 %v4413_v45, %v5182_v23  ;;  %v3632_v25 = vpop.f32.mrb[35].mxu0 }
0x10a1   :  { %v3641_v62 = vadd.f32 %v3632_v25, %v5184_v19 }
0x10a2   :  { %v5468_v7 = vadd.f32 %v3646_v51, %v3642_v21 }
0x10a3   :  { %v5470_v32 = vadd.f32 %v3646_v51, %v3641_v62 }
0x10a4   :  { %v3652_v63 = vsel %vm49_vm0, %v5468_v7, 0.0 }
0x10a5   :  { %3653 = vadd.xlane.f32.xlu0 %v3652_v63  ;;  %v3649_v15 = vsel %vm49_vm0, %v5470_v32, 0.0  ;;  %v4528_v63 = vpack.c.bf16 %v4006_v48, %v4005_v36 }
0x10a6   :  { %3650 = vadd.xlane.f32.xlu1 %v3649_v15  ;;  %v3704_v15 = vrot.slane %v5197_v40, %v4867_v50 }
0x10b7   :  { %4576 = vrot.lane.b32.xlu1 %v5420_v6, %s4728_s12 }
0x1132   :  { %v3654_v12 = vpop.xlane.xlu0 %3653 }
0x1133   :  { %v3656_v23 = vmul.f32 0.03125, %v3654_v12  ;;  %v3651_v20 = vpop.xlane.xlu1 %3650 }
0x1134   :  { %v3655_v3 = vmul.f32 0.03125, %v3651_v20 }
0x1135   :  { %v5479_v19 = vsub.f32 %v5468_v7, %v3656_v23 }
0x1136   :  { %v3657_v8 = vsub.f32 %v5470_v32, %v3655_v3 }
0x1137   :  { %v3660_v59 = vmul.f32 %v5479_v19, %v5479_v19  ;;  %v4577_v6 = vpop.permute.xlu1 %4576  ;;  %v3688_v51 = vmul.f32 %v3686_v29, %v5479_v19 }
0x1138   :  { %v3659_v14 = vmul.f32 %v3657_v8, %v3657_v8  ;;  %v4579_v30 = vunpack.i.h.bf16 %v4577_v6  ;;  %v4578_v31 = vunpack.i.l.bf16 %v4577_v6  ;;  %v3687_v47 = vmul.f32 %v3686_v29, %v3657_v8 }
0x1139   :  { %v3664_v18 = vsel %vm49_vm0, %v3660_v59, 0.0 }
0x113a   :  { %v3661_v60 = vsel %vm49_vm0, %v3659_v14, 0.0  ;;  %v4508_v54 = vpack.c.bf16 %v4579_v30, %v4578_v31  ;;  %v3886_v14 = vrot.slane %v5250_v26, %v1997_v16 }
0x113b   :  { %3662 = vadd.xlane.f32.xlu0 %v3661_v60 }
0x113c   :  { %4509 = vmatprep.subr.bf16.mxu1 %v4508_v54 }
0x113d   :  { %4511 = vmatpush3.bf16.msra.mxu1 %v4508_v54 }
0x113f   :  { %3665 = vadd.xlane.f32.xlu0 %v3664_v18 }
0x1155   :  { %4581 = vrot.lane.b32.xlu0 %v5424_v53, %s4728_s12  ;;  %v4002_v53 = vld [vmem:[%s5560_s5 + $0x58] sm:$0xff] }
0x1156   :  { %v4520_v52 = vpack.c.bf16 %v4002_v53, %v4001_v37 }
0x1158   :  { %4521 = vmatprep.subr.bf16.mxu0 %v4520_v52 }
0x1159   :  { %4523 = vmatpush3.bf16.msra.mxu0 %v4520_v52 }
0x115a   :  { %4525 = vmatprep.subr.bf16.mxu0 %v4524_v41 }
0x115d   :  { %4527 = vmatpush3.bf16.msra.mxu0 %v4524_v41 }
0x115e   :  { %4529 = vmatprep.subr.bf16.mxu0 %v4528_v63 }
0x1161   :  { %4531 = vmatpush3.bf16.msra.mxu0 %v4528_v63 }
0x11c8   :  { %v3663_v42 = vpop.xlane.xlu0 %3662 }
0x11c9   :  { %v3667_v10 = vmul.f32 0.032258064, %v3663_v42 }
0x11cb   :  { %4673 = vrsqrt.f32 %v3667_v10  ;;  %vm3671_vm3 = vcmp.eq.f32.partialorder %v3667_v10, inf  ;;  %v3674_v1 = vand.u32 2147483648, %v3667_v10  ;;  %vm3673_vm4 = vcmp.eq.f32.partialorder %v3667_v10, 0.0 }
0x11cc   :  { %v3666_v28 = vpop.xlane.xlu0 %3665 }
0x11cd   :  { %v3668_v11 = vmul.f32 0.032258064, %v3666_v28 }
0x11cf   :  { %4675 = vrsqrt.f32 %v3668_v11  ;;  %vm3678_vm5 = vcmp.eq.f32.partialorder %v3668_v11, inf  ;;  %v3681_v27 = vand.u32 2147483648, %v3668_v11  ;;  %vm3680_vm6 = vcmp.eq.f32.partialorder %v3668_v11, 0.0 }
0x11d0   :  { %v4582_v13 = vpop.permute.xlu0 %4581 }
0x11d1   :  { %v4584_v43 = vunpack.i.h.bf16 %v4582_v13  ;;  %v4583_v46 = vunpack.i.l.bf16 %v4582_v13 }
0x11d3   :  { %v4512_v35 = vpack.c.bf16 %v4584_v43, %v4583_v46 }
0x11d5   :  { %v4674_v56 = vpop.eup %4673  ;;  %4513 = vmatprep.subr.bf16.mxu1 %v4512_v35 }
0x11d6   :  { %v3670_v57 = vmul.f32 %v4674_v56, %v3667_v10  ;;  %4515 = vmatpush3.bf16.msra.mxu1 %v4512_v35 }
0x11d8   :  { %v3672_v2 = vsel %vm3671_vm3, %v3667_v10, %v3670_v57 }
0x11d9   :  { %v4676_v58 = vpop.eup %4675  ;;  %v3675_v24 = vsel %vm3673_vm4, %v3674_v1, %v3672_v2  ;;  %v4041_v2 = vld [vmem:[%s5563_s8] ss:$0 sm:$0xff] }
0x11da   :  { %v3677_v0 = vmul.f32 %v4676_v58, %v3668_v11  ;;  %v3689_v5 = vadd.f32 1e-06, %v3675_v24 }
0x11dc   :  { %v3679_v61 = vsel %vm3678_vm5, %v3668_v11, %v3677_v0  ;;  %4677 = vrcp.f32 %v3689_v5  ;;  %v4042_v5 = vld [vmem:[%s5563_s8 + $0x1] ss:$0 sm:$0xff] }
0x11dd   :  { %v3682_v44 = vsel %vm3680_vm6, %v3681_v27, %v3679_v61 }
0x11de   :  { %v3690_v49 = vadd.f32 1e-06, %v3682_v44 }
0x11e0   :  { %4679 = vrcp.f32 %v3690_v49 }
0x11e6   :  { %v4678_v55 = vpop.eup %4677 }
0x11e7   :  { %v3692_v22 = vmul.f32 %v4678_v55, %v3687_v47 }
0x11e9   :  { %v3699_v45 = vadd.f32 %v3698_v9, %v3692_v22 }
0x11ea   :  { %v4680_v21 = vpop.eup %4679 }
0x11eb   :  { %v3694_v25 = vmul.f32 %v4680_v21, %v3688_v51  ;;  %4422 = vmatprep.mubr.msk.f32.mxu1 %vm49_vm0, %v3699_v45 }
0x11ed   :  { %v3700_v62 = vadd.f32 %v3698_v9, %v3694_v25 }
0x11ef   :  { %4423 = vmatmul.mubr.msk.f32.vlgmr.msra.gmra.mrb[42].mxu1 %vm49_vm0, %v3700_v62 }
0x12c2   :  { %v4424_v12 = vpop.f32.mrb[42].mxu1 }
0x12c3   :  { %v3795_v23 = vadd.f32 %v4424_v12, %v3704_v15  ;;  %v3789_v20 = vpop.f32.mrb[43].mxu1 }
0x12c4   :  { %v3790_v3 = vadd.f32 %v3789_v20, %v3704_v15 }
0x12c5   :  { %v3799_v8 = vmax.f32 %v3795_v23, 0.0 }
0x12c6   :  { %v3798_v19 = vmax.f32 %v3790_v3, 0.0 }
0x12c8   :  { %4441 = vmatprep.mubr.msk.f32.mxu0 %vm1911_vm13, %v3798_v19 }
0x12c9   :  { %4442 = vmatmul.mubr.msk.f32.vlgmr.msra.gmra.mrb[36].mxu0 %vm1911_vm13, %v3799_v8 }
0x139c   :  { %v4443_v60 = vpop.f32.mrb[36].mxu0 }
0x139d   :  { %v3882_v59 = vadd.f32 %v4443_v60, %v5468_v7  ;;  %v3872_v18 = vpop.f32.mrb[37].mxu0 }
0x139e   :  { %v3881_v50 = vadd.f32 %v3872_v18, %v5470_v32 }
0x139f   :  { %v3888_v40 = vadd.f32 %v3886_v14, %v3882_v59 }
0x13a0   :  { %v3887_v6 = vadd.f32 %v3886_v14, %v3881_v50 }
0x13a1   :  { %v3894_v30 = vsel %vm49_vm0, %v3888_v40, 0.0 }
0x13a2   :  { %3895 = vadd.xlane.f32.xlu0 %v3894_v30  ;;  %v3891_v31 = vsel %vm49_vm0, %v3887_v6, 0.0 }
0x13a3   :  { %3892 = vadd.xlane.f32.xlu1 %v3891_v31 }
0x142f   :  { %v3896_v54 = vpop.xlane.xlu0 %3895 }
0x1430   :  { %v3898_v33 = vmul.f32 0.03125, %v3896_v54  ;;  %v3893_v34 = vpop.xlane.xlu1 %3892 }
0x1431   :  { %v3897_v39 = vmul.f32 0.03125, %v3893_v34 }
0x1432   :  { %v3900_v37 = vsub.f32 %v3888_v40, %v3898_v33 }
0x1433   :  { %v3899_v16 = vsub.f32 %v3887_v6, %v3897_v39 }
0x1434   :  { %v3902_v26 = vmul.f32 %v3900_v37, %v3900_v37  ;;  %v3930_v58 = vmul.f32 %v4041_v2, %v3900_v37 }
0x1435   :  { %v3901_v17 = vmul.f32 %v3899_v16, %v3899_v16  ;;  %v3929_v0 = vmul.f32 %v4041_v2, %v3899_v16 }
0x1436   :  { %v3906_v7 = vsel %vm49_vm0, %v3902_v26, 0.0 }
0x1437   :  { %3907 = vadd.xlane.f32.xlu0 %v3906_v7  ;;  %v3903_v32 = vsel %vm49_vm0, %v3901_v17, 0.0 }
0x1438   :  { %3904 = vadd.xlane.f32.xlu1 %v3903_v32 }
0x14c4   :  { %v3908_v53 = vpop.xlane.xlu0 %3907 }
0x14c5   :  { %v3910_v52 = vmul.f32 0.032258064, %v3908_v53  ;;  %v3905_v38 = vpop.xlane.xlu1 %3904 }
0x14c6   :  { %v3909_v4 = vmul.f32 0.032258064, %v3905_v38 }
0x14c7   :  { %4681 = vrsqrt.f32 %v3910_v52  ;;  %vm3920_vm7 = vcmp.eq.f32.partialorder %v3910_v52, inf  ;;  %v3923_v28 = vand.u32 2147483648, %v3910_v52  ;;  %vm3922_vm8 = vcmp.eq.f32.partialorder %v3910_v52, 0.0 }
0x14c8   :  { %4683 = vrsqrt.f32 %v3909_v4  ;;  %vm3913_vm9 = vcmp.eq.f32.partialorder %v3909_v4, inf  ;;  %v3916_v43 = vand.u32 2147483648, %v3909_v4  ;;  %vm3915_vm10 = vcmp.eq.f32.partialorder %v3909_v4, 0.0 }
0x14d1   :  { %v4682_v41 = vpop.eup %4681 }
0x14d2   :  { %v4684_v42 = vpop.eup %4683  ;;  %v3919_v10 = vmul.f32 %v4682_v41, %v3910_v52 }
0x14d3   :  { %v3912_v11 = vmul.f32 %v4684_v42, %v3909_v4 }
0x14d4   :  { %v3921_v13 = vsel %vm3920_vm7, %v3910_v52, %v3919_v10 }
0x14d5   :  { %v3924_v46 = vsel %vm3922_vm8, %v3923_v28, %v3921_v13  ;;  %v3914_v35 = vsel %vm3913_vm9, %v3909_v4, %v3912_v11 }
0x14d6   :  { %v3932_v56 = vadd.f32 1e-06, %v3924_v46  ;;  %v3917_v57 = vsel %vm3915_vm10, %v3916_v43, %v3914_v35 }
0x14d7   :  { %v3931_v1 = vadd.f32 1e-06, %v3917_v57 }
0x14d8   :  { %4685 = vrcp.f32 %v3932_v56 }
0x14d9   :  { %4687 = vrcp.f32 %v3931_v1 }
0x14e2   :  { %v4686_v24 = vpop.eup %4685 }
0x14e3   :  { %v4688_v27 = vpop.eup %4687  ;;  %v3936_v61 = vmul.f32 %v4686_v24, %v3930_v58 }
0x14e4   :  { %v3934_v44 = vmul.f32 %v4688_v27, %v3929_v0 }
0x14e5   :  { %v3942_v49 = vadd.f32 %v4042_v5, %v3936_v61 }
0x14e6   :  { %v3941_v29 = vadd.f32 %v4042_v5, %v3934_v44 }
0x14e7   :  { %3944 = vst.msk [vmem:[#allocation2 + $0x8] sm:$0xff] %vm49_vm0, %v3942_v49 }
0x14e8   :  { %3943 = vst.msk [vmem:[#allocation2] sm:$0xff] %vm49_vm0, %v3941_v29 }
0x14e9   :  { %4706 = shalt.err (!%p4703_p4)
}
0x14ea   :  { %s4707_s1 = scalar_lea.hbm %s5564_s9, 256 }
0x14eb   :  { %p4708_p5 = scmp.ne.s32.totalorder %s5564_s9, %s4707_s1  ;;  %p4711_p6 = scmp.lt.u32.totalorder %s4707_s1, %s5564_s9 }
0x14ed   :  { %p4713_p7 = pnand %p4711_p6, %p4708_p5 }
0x14ef   :  { %4716 = shalt.err (!%p4713_p7)
}
0x14f0   :  { %s4731_s29 = smov 128  }
0x14f1   :  { %3956 = dma.vmem_to_hbm [thread:$0]  %s3951_s26, 256, %s5564_s9, [#allocation3], %s4731_s29, %s4731_s29, %s4725_s30  }
0x14f2   :  { %4717 = dma.done.wait [#allocation3], 256  }
0x14f3   :  { %4718 = vsyncadd [#allocation3], 4294967040 }
0x14f4   :  { %3960 = vsyncpa [#allocation3], 1 }

</bundles_post_ra>
